<compile_context>
chip_gen: v7x
topology: tpu7x:2x2x1
jax: 0.10.0
libtpu: 0.0.40
codegen_flags: <defaults>
</compile_context>

<pallas_src>
import functools
import math

import jax
import jax.numpy as jnp
from jax.experimental import pallas as pl
from jax.experimental.pallas import tpu as pltpu


# ---------------------------------------------------------------------------
# Kernel: one (rb, hb, W) tile per grid step -> one (rb, (hb//kh)*Wo) tile out.
# ---------------------------------------------------------------------------
def _pool_kernel(x_ref, o_ref, *, kh, kw):
    rb, hb, w = x_ref.shape
    hob = hb // kh
    wo = w // kw
    inv = 1.0 / float(kh * kw)

    # ---- H pooling: kh sublane-strided taps, fused max + f32 sum (single read)
    t = x_ref[:, pl.ds(0, hob, stride=kh), :]            # (rb, hob, w), input dtype
    hmax = t
    hsum = t.astype(jnp.float32)
    for i in range(1, kh):
        t = x_ref[:, pl.ds(i, hob, stride=kh), :]
        hmax = jnp.maximum(hmax, t)
        hsum = hsum + t.astype(jnp.float32)

    # ---- W pooling on the lane axis: split w -> (wo, kw), reduce trailing kw
    wmax = jnp.max(hmax.reshape(rb, hob, wo, kw), axis=-1).astype(jnp.float32)
    wsum = jnp.sum(hsum.reshape(rb, hob, wo, kw), axis=-1)

    out = 0.5 * (wmax + wsum * inv)                      # (rb, hob, wo), f32
    # Lane-dense store: minor dim hob*wo is wide even when Wo < 128.
    o_ref[...] = out.reshape(rb, hob * wo).astype(o_ref.dtype)


# ---------------------------------------------------------------------------
# Tiling helpers.
# ---------------------------------------------------------------------------
def _divisor_blocks(total, quantum):
    """All divisors of `total` that are positive multiples of `quantum`."""
    if quantum <= 0 or total < quantum:
        return []
    return [d for d in range(quantum, total + 1, quantum) if total % d == 0]


def _vmem_capacity_bytes():
    try:
        cap = getattr(pltpu.get_tpu_info(), "vmem_capacity_bytes", None)
        if cap:
            return int(cap)
    except Exception:
        pass
    return 64 * 1024 * 1024          # conservative default (v7x per-core VMEM)


# ---------------------------------------------------------------------------
# Wrapper: NCHW in / NCHW out.  Matches F.max_pool2d / F.avg_pool2d defaults
# (stride = kernel_size, no padding, floor mode).
# ---------------------------------------------------------------------------
@functools.partial(jax.jit, static_argnames=("kernel_size",))
def custom_pooling(x, kernel_size):
    if isinstance(kernel_size, (tuple, list)):
        kh, kw = int(kernel_size[0]), int(kernel_size[1])
    else:
        kh = kw = int(kernel_size)

    N, C, H, W = x.shape
    Ho, Wo = H // kh, W // kw
    if (H, W) != (Ho * kh, Wo * kw):     # PyTorch floor mode: drop the remainder
        x = x[:, :, : Ho * kh, : Wo * kw]
        H, W = Ho * kh, Wo * kw

    NC = N * C
    x3 = x.reshape(NC, H, W)             # free: contiguous NCHW view
    itemsize = x.dtype.itemsize
    sub_q = {1: 32, 2: 16}.get(itemsize, 8)      # dtype-aware sublane quantum

    # ---- generation-aware per-tile budget ---------------------------------
    vmem_cap = _vmem_capacity_bytes()
    budget = max(2 << 20, vmem_cap // 10)        # ~12 MiB (v5e/v6e), ~6 MiB (v7x)

    plane = H * W * itemsize
    rb, hb = NC, H
    if NC * plane > budget:
        # Tile merged N*C first: full contiguous planes per DMA segment.
        cands = _divisor_blocks(NC, sub_q)
        fit = [d for d in cands if d * plane <= budget]
        if fit:
            rb = max(fit)
        elif cands:
            rb = min(cands)
        else:
            rb = NC
        if rb * plane > budget:
            # Planes themselves are too big: tile H too.  hb keeps the input
            # block sublane-aligned and the flattened output block a multiple
            # of 128 lanes.
            need = 128 // math.gcd(Wo, 128)
            q_h = math.lcm(sub_q, kh * need)
            cands_h = _divisor_blocks(H, q_h)
            fit_h = [d for d in cands_h if rb * d * W * itemsize <= budget]
            if fit_h:
                hb = max(fit_h)
            elif cands_h:
                hb = min(cands_h)
            else:
                hb = H

    hob = hb // kh
    grid = (NC // rb, H // hb)

    # VMEM limit: 2x double-buffered in/out tiles + f32 intermediates + slack,
    # clamped to 3/4 of the chip's physical VMEM.
    in_tile = rb * hb * W * itemsize
    out_tile = rb * hob * Wo * itemsize
    inter = 4 * rb * hob * W * 4
    needed = 2 * (in_tile + out_tile) + inter + (2 << 20)
    vmem_limit = int(min(max(needed, 32 << 20), (vmem_cap * 3) // 4))

    kernel = functools.partial(_pool_kernel, kh=kh, kw=kw)
    out2 = pl.pallas_call(
        kernel,
        out_shape=jax.ShapeDtypeStruct((NC, Ho * Wo), x.dtype),
        grid_spec=pltpu.PrefetchScalarGridSpec(
            num_scalar_prefetch=0,
            grid=grid,
            in_specs=[pl.BlockSpec((rb, hb, W), lambda r, h: (r, h, 0))],
            out_specs=pl.BlockSpec((rb, hob * Wo), lambda r, h: (r, h)),
        ),
        compiler_params=pltpu.CompilerParams(
            dimension_semantics=("parallel", "parallel"),
            vmem_limit_bytes=vmem_limit,
        ),
    )(x3)
    return out2.reshape(N, C, Ho, Wo)


# ---------------------------------------------------------------------------
# Pure-JAX reference (mirrors the PyTorch forward exactly).
# ---------------------------------------------------------------------------
def _reference(x, kernel_size):
    if isinstance(kernel_size, (tuple, list)):
        kh, kw = kernel_size
    else:
        kh = kw = kernel_size
    Ho, Wo = x.shape[2] // kh, x.shape[3] // kw
    x = x[:, :, : Ho * kh, : Wo * kw]
    neg_inf = jnp.array(-jnp.inf, dtype=x.dtype)
    zero = jnp.array(0, dtype=x.dtype)
    mx = jax.lax.reduce_window(x, neg_inf, jax.lax.max,
                               (1, 1, kh, kw), (1, 1, kh, kw), "VALID")
    sm = jax.lax.reduce_window(x, zero, jax.lax.add,
                               (1, 1, kh, kw), (1, 1, kh, kw), "VALID")
    return 0.5 * (mx + sm / (kh * kw))


if __name__ == "__main__":
    # TODO(synk): the module's logger.debug call has no Pallas equivalent; omitted.
    N, C, H, W = 2, 4, 16, 16
    kernel_size = 2

    x = jax.random.normal(jax.random.PRNGKey(0), (N, C, H, W), jnp.float32)

    out = jax.block_until_ready(custom_pooling(x, kernel_size=kernel_size))
    ref = _reference(x, kernel_size)

    assert out.shape == ref.shape and out.dtype == ref.dtype
    assert jnp.allclose(out, ref, rtol=1e-5, atol=1e-5), "mismatch vs reference"

    print("KERNEL_OK")
</pallas_src>

<mosaic_0001>
module attributes {stable_mosaic.version = 11 : i64} {
  func.func @_pool_kernel(%arg0: i32, %arg1: i32, %arg2: memref<8x16x16xf32, #tpu.memory_space<vmem>>, %arg3: memref<8x64xf32, #tpu.memory_space<vmem>>) attributes {dimension_semantics = [#tpu.dimension_semantics<parallel>, #tpu.dimension_semantics<parallel>], iteration_bounds = array<i64: 1, 1>, scalar_prefetch = 0 : i64, scratch_operands = 0 : i64, tpu.core_type = #tpu.core_type<tc>, window_params = [{transform_indices = @transform_0, window_bounds = array<i64: 8, 16, 16>}, {transform_indices = @transform_1, window_bounds = array<i64: 8, 64>}]} {
    %c0 = arith.constant 0 : index
    %c0_0 = arith.constant 0 : index
    %c0_1 = arith.constant 0 : index
    %0 = tpu.strided_load %arg2[%c0, %c0_0, %c0_1] {strides = array<i32: 1, 2, 1>} : memref<8x16x16xf32, #tpu.memory_space<vmem>>, vector<8x8x16xf32>
    %c0_2 = arith.constant 0 : index
    %c1 = arith.constant 1 : index
    %c0_3 = arith.constant 0 : index
    %1 = tpu.strided_load %arg2[%c0_2, %c1, %c0_3] {strides = array<i32: 1, 2, 1>} : memref<8x16x16xf32, #tpu.memory_space<vmem>>, vector<8x8x16xf32>
    %2 = arith.maximumf %0, %1 : vector<8x8x16xf32>
    %3 = arith.addf %0, %1 : vector<8x8x16xf32>
    %4 = vector.shape_cast %2 : vector<8x8x16xf32> to vector<8x8x8x2xf32>
    %cst = arith.constant dense<0xFF800000> : vector<8x8x8xf32>
    %5 = vector.multi_reduction <maximumf>, %4, %cst [3] : vector<8x8x8x2xf32> to vector<8x8x8xf32>
    %6 = vector.shape_cast %3 : vector<8x8x16xf32> to vector<8x8x8x2xf32>
    %cst_4 = arith.constant dense<0.000000e+00> : vector<8x8x8xf32>
    %7 = vector.multi_reduction <add>, %6, %cst_4 [3] : vector<8x8x8x2xf32> to vector<8x8x8xf32>
    %cst_5 = arith.constant 2.500000e-01 : f32
    %8 = vector.broadcast %cst_5 : f32 to vector<8x8x8xf32>
    %9 = arith.mulf %7, %8 : vector<8x8x8xf32>
    %10 = arith.addf %5, %9 : vector<8x8x8xf32>
    %cst_6 = arith.constant 5.000000e-01 : f32
    %11 = vector.broadcast %cst_6 : f32 to vector<8x8x8xf32>
    %12 = arith.mulf %11, %10 : vector<8x8x8xf32>
    %13 = vector.shape_cast %12 : vector<8x8x8xf32> to vector<8x64xf32>
    %c0_7 = arith.constant 0 : index
    %c0_8 = arith.constant 0 : index
    %14 = vector.load %arg3[%c0_7, %c0_8] : memref<8x64xf32, #tpu.memory_space<vmem>>, vector<8x64xf32>
    tpu.vector_store %arg3[%c0_7, %c0_8], %13 {strides = array<i32>} : memref<8x64xf32, #tpu.memory_space<vmem>>, vector<8x64xf32>,
    return
  }
  func.func @transform_0(%arg0: i32, %arg1: i32) -> (i32, i32, i32) {
    %c0_i32 = arith.constant 0 : i32
    %c0_i32_0 = arith.constant 0 : i32
    return %arg0, %arg1, %c0_i32 : i32, i32, i32
  }
  func.func @transform_1(%arg0: i32, %arg1: i32) -> (i32, i32) {
    %c0_i32 = arith.constant 0 : i32
    return %arg0, %arg1 : i32, i32
  }
}

</mosaic_0001>

<bundles_post_ra>
// kernel: custom_pooling.1
= control target key start
LH: loop header
LB: loop body
LE: loop exit
PB: predicated region body
PF: predicated region fallthrough
CT: control target
= control target key end

     0   :  { %6 = vsyncpa [#allocation3], 0  ;;  %s3810_s6 = smov [#allocation2]   ;;  %s5677_s0 = inlined_call_operand.hbm [shape: f32[8,16,16], index: 0, kind: input, shape index: {}]   ;;  %s5678_s1 = inlined_call_operand.vmem [shape: f32[8,64], index: 1, kind: output, shape index: {}]  }
   0x1   :  { %s12_s7 = sshll.u32 %s3810_s6, 4  ;;  %s3786_s10 = scalar_lea.hbm %s5677_s0, 2048  ;;  %s13_s7 = int_to_ptr.vmem [resolvable:$true] %s12_s7 }
   0x2   :  { %p3787_p0 = scmp.ne.s32.totalorder %s5677_s0, %s3786_s10  ;;  %p3790_p1 = scmp.lt.u32.totalorder %s3786_s10, %s5677_s0 }
   0x4   :  { %p3792_p2 = pnand %p3790_p1, %p3787_p0 }
   0x6   :  { %3795 = shalt.err (!%p3792_p2)
}
   0x7   :  { %s3796_s15 = scalar_lea.vmem %s13_s7, 2048  ;;  %p3801_p4 = scmp.lt.s32.totalorder %s13_s7, %s13_s7 }
   0x8   :  { %p3797_p3 = scmp.ne.s32.totalorder %s13_s7, %s3796_s15  ;;  %p3802_p5 = scmp.lt.s32.totalorder %s3796_s15, %s3796_s15 }
   0xa   :  { %p3803_p6 = por %p3802_p5, %p3801_p4 }
   0xc   :  { %p3804_p7 = pnand %p3803_p6, %p3797_p3 }
   0xe   :  { %3807 = shalt.err (!%p3804_p7)
}
   0xf   :  { %s3811_s16 = smov 128   ;;  %s3812_s17 = smov 8  }
  0x10   :  { %18 = dma.hbm_to_vmem [thread:$0]  %s5677_s0, 2048, %s13_s7, [#allocation3], %s3811_s16, %s3811_s16, %s3812_s17  }
  0x11   :  { %3808 = dma.done.wait [#allocation3], 2048  }
  0x12   :  { %3809 = vsyncadd [#allocation3], 4294965248  ;;  %v26_v0 = vld [vmem:[#allocation2 + $0x20] ss:$2 sm:$0xff]  ;;  %v42_v1 = vld [vmem:[#allocation2 + $0x21] ss:$2 sm:$0xff] }
  0x13   :  { %v22_v2 = vld [vmem:[#allocation2] ss:$2 sm:$0xff]  ;;  %v3851_v3 = vmax.f32 %v26_v0, %v42_v1  ;;  %v38_v4 = vld [vmem:[#allocation2 + $0x1] ss:$2 sm:$0xff]  ;;  %v28_v5 = vld [vmem:[#allocation2 + $0x30] ss:$2 sm:$0xff] }
  0x14   :  { %v44_v6 = vld [vmem:[#allocation2 + $0x31] ss:$2 sm:$0xff]  ;;  %v3853_v7 = vmax.f32 %v22_v2, %v38_v4  ;;  %v24_v8 = vld [vmem:[#allocation2 + $0x10] ss:$2 sm:$0xff]  ;;  %s3813_s20 = smov 126   ;;  %s3814_s0 = smov 124  }
  0x15   :  { %v40_v9 = vld [vmem:[#allocation2 + $0x11] ss:$2 sm:$0xff]  ;;  %81 = vrot.lane.b32.xlu1 %v3851_v3, %s3813_s20  ;;  %v3857_v10 = vmax.f32 %v28_v5, %v44_v6  ;;  %v32_v12 = vld [vmem:[#allocation2 + $0x50] ss:$2 sm:$0xff]  ;;  %v30_v14 = vld [vmem:[#allocation2 + $0x40] ss:$2 sm:$0xff]  ;;  %v5680_v6 = vlaneseq }
  0x16   :  { %77 = vrot.lane.b32.xlu0 %v3853_v7, %s3813_s20  ;;  %v3861_v11 = vmax.f32 %v24_v8, %v40_v9  ;;  %v48_v13 = vld [vmem:[#allocation2 + $0x51] ss:$2 sm:$0xff]  ;;  %v46_v15 = vld [vmem:[#allocation2 + $0x41] ss:$2 sm:$0xff]  ;;  %v36_v18 = vld [vmem:[#allocation2 + $0x70] ss:$2 sm:$0xff] }
  0x17   :  { %v3865_v16 = vmax.f32 %v32_v12, %v48_v13  ;;  %v3869_v17 = vmax.f32 %v30_v14, %v46_v15  ;;  %v52_v19 = vld [vmem:[#allocation2 + $0x71] ss:$2 sm:$0xff]  ;;  %v34_v20 = vld [vmem:[#allocation2 + $0x60] ss:$2 sm:$0xff]  ;;  %v50_v21 = vld [vmem:[#allocation2 + $0x61] ss:$2 sm:$0xff] }
  0x18   :  { %v3873_v22 = vmax.f32 %v36_v18, %v52_v19  ;;  %v3877_v23 = vmax.f32 %v34_v20, %v50_v21  ;;  %s3815_s21 = smov 122   ;;  %s3816_s22 = smov 120   ;;  %v3820_v4 = vmov 1983009808   ;;  %v4060_v13 = vshrl.u32 %v5680_v6, 7 }
  0x19   :  { %83 = vrot.lane.b32.xlu1 %v3857_v10, %s3813_s20  ;;  %s3817_s23 = smov 118   ;;  %s3818_s24 = smov 116   ;;  %v248_v5 = vunpack.c.l.s4 %v3820_v4  ;;  %v3821_v18 = vmov 1934713408   ;;  %vm1333_vm0 = vcmask 15360   ;;  %vm3496_vm1 = vcmask 1041409  }
  0x1a   :  { %79 = vrot.lane.b32.xlu0 %v3861_v11, %s3813_s20  ;;  %5751 = vst [vmem:[#allocation5_spill] sm:$0xff] %v3873_v22  ;;  %5752 = vst [vmem:[#allocation6_spill] sm:$0xff] %v3877_v23  ;;  %s3819_s25 = smov 114   ;;  %v312_v19 = vunpack.c.l.s4 %v3821_v18  ;;  %vm3498_vm2 = vcmask 1042434   ;;  %vm3500_vm3 = vcmask 1043459   ;;  %vm3502_vm4 = vcmask 1044484  }
  0x1b   :  { %v249_v12 = vunpack.c.0.s8 %v248_v5  ;;  %5765 = vst [vmem:[#allocation19_spill] sm:$0xff] %v4060_v13  ;;  %vm3504_vm5 = vcmask 1045509   ;;  %vm3506_vm6 = vcmask 1046534   ;;  %vm3508_vm7 = vcmask 1047559   ;;  %s3822_s26 = smov 16   ;;  %s3823_s27 = smov 40  }
  0x1c   :  { %s3824_s28 = smov 24   ;;  %s3825_s29 = smov 56   ;;  %vm3731_vm8 = vcmask 64512   ;;  %vm3733_vm9 = vcmask 130048   ;;  %vm3735_vm10 = vcmask 195584   ;;  %vm3737_vm11 = vcmask 261120  }
  0x1d   :  { %87 = vrot.lane.b32.xlu1 %v3865_v16, %s3813_s20  ;;  %v4068_v21 = vsub.s32 %v249_v12, %v4060_v13  ;;  %s3826_s30 = smov 32   ;;  %s3827_s2 = smov 48   ;;  %vm3739_vm12 = vcmask 326656   ;;  %vm3741_vm13 = vcmask 392192   ;;  %vm3743_vm14 = vcmask 457728  }
  0x1e   :  { %85 = vrot.lane.b32.xlu0 %v3869_v17, %s3813_s20  ;;  %vm3745_vm15 = vcmask 523264  }
  0x21   :  { %91 = vrot.lane.b32.xlu1 %v3873_v22, %s3813_s20 }
  0x22   :  { %89 = vrot.lane.b32.xlu0 %v3877_v23, %s3813_s20 }
  0x25   :  { %103 = vrot.lane.b32.xlu1 %v3861_v11, %s3814_s0 }
  0x26   :  { %101 = vrot.lane.b32.xlu0 %v3853_v7, %s3814_s0 }
  0x29   :  { %107 = vrot.lane.b32.xlu1 %v3857_v10, %s3814_s0 }
  0x2a   :  { %105 = vrot.lane.b32.xlu0 %v3851_v3, %s3814_s0 }
  0x2d   :  { %111 = vrot.lane.b32.xlu1 %v3865_v16, %s3814_s0 }
  0x2e   :  { %109 = vrot.lane.b32.xlu0 %v3869_v17, %s3814_s0 }
  0x31   :  { %115 = vrot.lane.b32.xlu1 %v3873_v22, %s3814_s0 }
  0x32   :  { %113 = vrot.lane.b32.xlu0 %v3877_v23, %s3814_s0 }
  0x35   :  { %127 = vrot.lane.b32.xlu1 %v3861_v11, %s3815_s21 }
  0x36   :  { %125 = vrot.lane.b32.xlu0 %v3853_v7, %s3815_s21 }
  0x39   :  { %131 = vrot.lane.b32.xlu1 %v3857_v10, %s3815_s21 }
  0x3a   :  { %129 = vrot.lane.b32.xlu0 %v3851_v3, %s3815_s21 }
  0x3d   :  { %135 = vrot.lane.b32.xlu1 %v3865_v16, %s3815_s21 }
  0x3e   :  { %133 = vrot.lane.b32.xlu0 %v3869_v17, %s3815_s21 }
  0x41   :  { %139 = vrot.lane.b32.xlu1 %v3873_v22, %s3815_s21 }
  0x42   :  { %137 = vrot.lane.b32.xlu0 %v3877_v23, %s3815_s21 }
  0x45   :  { %151 = vrot.lane.b32.xlu1 %v3861_v11, %s3816_s22 }
  0x46   :  { %149 = vrot.lane.b32.xlu0 %v3853_v7, %s3816_s22 }
  0x49   :  { %155 = vrot.lane.b32.xlu1 %v3857_v10, %s3816_s22 }
  0x4a   :  { %153 = vrot.lane.b32.xlu0 %v3851_v3, %s3816_s22 }
  0x4d   :  { %159 = vrot.lane.b32.xlu1 %v3865_v16, %s3816_s22 }
  0x4e   :  { %157 = vrot.lane.b32.xlu0 %v3869_v17, %s3816_s22 }
  0x51   :  { %163 = vrot.lane.b32.xlu1 %v3873_v22, %s3816_s22 }
  0x52   :  { %161 = vrot.lane.b32.xlu0 %v3877_v23, %s3816_s22 }
  0x55   :  { %175 = vrot.lane.b32.xlu1 %v3861_v11, %s3817_s23 }
  0x56   :  { %173 = vrot.lane.b32.xlu0 %v3853_v7, %s3817_s23 }
  0x59   :  { %179 = vrot.lane.b32.xlu1 %v3857_v10, %s3817_s23 }
  0x5a   :  { %177 = vrot.lane.b32.xlu0 %v3851_v3, %s3817_s23 }
  0x5d   :  { %183 = vrot.lane.b32.xlu1 %v3865_v16, %s3817_s23 }
  0x5e   :  { %181 = vrot.lane.b32.xlu0 %v3869_v17, %s3817_s23 }
  0x61   :  { %187 = vrot.lane.b32.xlu1 %v3873_v22, %s3817_s23 }
  0x62   :  { %185 = vrot.lane.b32.xlu0 %v3877_v23, %s3817_s23 }
  0x65   :  { %199 = vrot.lane.b32.xlu1 %v3861_v11, %s3818_s24 }
  0x66   :  { %197 = vrot.lane.b32.xlu0 %v3853_v7, %s3818_s24 }
  0x69   :  { %203 = vrot.lane.b32.xlu1 %v3857_v10, %s3818_s24 }
  0x6a   :  { %201 = vrot.lane.b32.xlu0 %v3851_v3, %s3818_s24 }
  0x6d   :  { %207 = vrot.lane.b32.xlu1 %v3865_v16, %s3818_s24 }
  0x6e   :  { %205 = vrot.lane.b32.xlu0 %v3869_v17, %s3818_s24 }
  0x71   :  { %211 = vrot.lane.b32.xlu1 %v3873_v22, %s3818_s24 }
  0x72   :  { %209 = vrot.lane.b32.xlu0 %v3877_v23, %s3818_s24 }
  0x75   :  { %223 = vrot.lane.b32.xlu1 %v3861_v11, %s3819_s25 }
  0x76   :  { %221 = vrot.lane.b32.xlu0 %v3853_v7, %s3819_s25 }
  0x79   :  { %227 = vrot.lane.b32.xlu1 %v3857_v10, %s3819_s25 }
  0x7a   :  { %225 = vrot.lane.b32.xlu0 %v3851_v3, %s3819_s25 }
  0x7d   :  { %231 = vrot.lane.b32.xlu1 %v3865_v16, %s3819_s25 }
  0x7e   :  { %229 = vrot.lane.b32.xlu0 %v3869_v17, %s3819_s25 }
  0x81   :  { %235 = vrot.lane.b32.xlu1 %v3873_v22, %s3819_s25 }
  0x82   :  { %233 = vrot.lane.b32.xlu0 %v3877_v23, %s3819_s25 }
  0x87   :  { %v3979_v24 = vpop.permute.xlu1 %81 }
  0x88   :  { %v3981_v25 = vpop.permute.xlu0 %77 }
  0x8b   :  { %v3983_v26 = vpop.permute.xlu1 %83 }
  0x8c   :  { %v3985_v27 = vpop.permute.xlu0 %79 }
  0x8f   :  { %v3987_v28 = vpop.permute.xlu1 %87 }
  0x90   :  { %v3989_v29 = vpop.permute.xlu0 %85 }
  0x93   :  { %v3991_v30 = vpop.permute.xlu1 %91 }
  0x94   :  { %5753 = vst [vmem:[#allocation7_spill] sm:$0xff] %v3991_v30  ;;  %v3993_v31 = vpop.permute.xlu0 %89 }
  0x95   :  { %5754 = vst [vmem:[#allocation8_spill] sm:$0xff] %v3993_v31 }
  0x97   :  { %v3995_v32 = vpop.permute.xlu1 %103 }
  0x98   :  { %v102_v33 = vpop.permute.xlu0 %101 }
  0x99   :  { %v245_v4 = vcombine.low %v3853_v7, %v102_v33  ;;  %v246_v6 = vcombine.high %v3853_v7, %v102_v33 }
  0x9b   :  { %v3997_v34 = vpop.permute.xlu1 %107  ;;  %v253_v18 = vrot.slane %v245_v4, %v4068_v21 }
  0x9c   :  { %v3999_v35 = vpop.permute.xlu0 %105 }
  0x9f   :  { %v4001_v36 = vpop.permute.xlu1 %111 }
  0xa0   :  { %v4003_v37 = vpop.permute.xlu0 %109 }
  0xa3   :  { %v4005_v38 = vpop.permute.xlu1 %115 }
  0xa4   :  { %5755 = vst [vmem:[#allocation9_spill] sm:$0xff] %v4005_v38  ;;  %v4007_v39 = vpop.permute.xlu0 %113 }
  0xa5   :  { %5756 = vst [vmem:[#allocation10_spill] sm:$0xff] %v4007_v39 }
  0xa7   :  { %v4009_v40 = vpop.permute.xlu1 %127 }
  0xa8   :  { %v126_v41 = vpop.permute.xlu0 %125 }
  0xa9   :  { %v261_v15 = vcombine.low %v3981_v25, %v126_v41  ;;  %v262_v5 = vcombine.high %v3981_v25, %v126_v41 }
  0xab   :  { %v4011_v42 = vpop.permute.xlu1 %131  ;;  %v269_v30 = vrot.slane %v261_v15, %v4068_v21  ;;  %v276_v12 = vrot.slane %v262_v5, %v4068_v21  ;;  %v381_v15 = vcombine.low %v3861_v11, %v3995_v32 }
  0xac   :  { %v4013_v43 = vpop.permute.xlu0 %129 }
  0xad   :  { %v309_v25 = vcombine.low %v253_v18, %v269_v30  ;;  %v389_v31 = vrot.slane %v381_v15, %v4068_v21 }
  0xaf   :  { %v4015_v44 = vpop.permute.xlu1 %135 }
  0xb0   :  { %v4017_v45 = vpop.permute.xlu0 %133 }
  0xb3   :  { %v4019_v46 = vpop.permute.xlu1 %139 }
  0xb4   :  { %5757 = vst [vmem:[#allocation11_spill] sm:$0xff] %v4019_v46  ;;  %v4021_v47 = vpop.permute.xlu0 %137  ;;  %v313_v46 = vunpack.c.0.s8 %v312_v19 }
  0xb5   :  { %5758 = vst [vmem:[#allocation12_spill] sm:$0xff] %v4021_v47 }
  0xb6   :  { %v4081_v7 = vsub.s32 %v313_v46, %v4060_v13 }
  0xb7   :  { %v4023_v48 = vpop.permute.xlu1 %151 }
  0xb8   :  { %v150_v49 = vpop.permute.xlu0 %149 }
  0xbb   :  { %v4025_v50 = vpop.permute.xlu1 %155 }
  0xbc   :  { %v4027_v51 = vpop.permute.xlu0 %153 }
  0xbf   :  { %v4029_v52 = vpop.permute.xlu1 %159 }
  0xc0   :  { %5759 = vst [vmem:[#allocation13_spill] sm:$0xff] %v4029_v52  ;;  %v4031_v53 = vpop.permute.xlu0 %157 }
  0xc3   :  { %v4033_v54 = vpop.permute.xlu1 %163 }
  0xc4   :  { %5760 = vst [vmem:[#allocation14_spill] sm:$0xff] %v4033_v54  ;;  %v4035_v55 = vpop.permute.xlu0 %161 }
  0xc5   :  { %5761 = vst [vmem:[#allocation15_spill] sm:$0xff] %v4035_v55  ;;  %v260_v55 = vrot.slane %v246_v6, %v4068_v21 }
  0xc7   :  { %v4037_v56 = vpop.permute.xlu1 %175  ;;  %v325_v46 = vcombine.low %v260_v55, %v276_v12 }
  0xc8   :  { %v174_v57 = vpop.permute.xlu0 %173 }
  0xcb   :  { %v4039_v58 = vpop.permute.xlu1 %179 }
  0xcc   :  { %v4041_v59 = vpop.permute.xlu0 %177 }
  0xcf   :  { %v4043_v60 = vpop.permute.xlu1 %183 }
  0xd0   :  { %v4045_v61 = vpop.permute.xlu0 %181 }
  0xd3   :  { %v4047_v62 = vpop.permute.xlu1 %187 }
  0xd4   :  { %5762 = vst [vmem:[#allocation16_spill] sm:$0xff] %v4047_v62  ;;  %v4049_v63 = vpop.permute.xlu0 %185 }
  0xd5   :  { %5763 = vst [vmem:[#allocation17_spill] sm:$0xff] %v4049_v63 }
  0xd7   :  { %v4051_v0 = vpop.permute.xlu1 %199 }
  0xd8   :  { %v198_v1 = vpop.permute.xlu0 %197  ;;  %v413_v6 = vcombine.low %v4023_v48, %v4051_v0 }
  0xd9   :  { %v277_v22 = vcombine.low %v150_v49, %v198_v1  ;;  %v278_v38 = vcombine.high %v150_v49, %v198_v1 }
  0xda   :  { %v421_v63 = vrot.slane %v413_v6, %v4068_v21  ;;  %v382_v6 = vcombine.high %v3861_v11, %v3995_v32 }
  0xdb   :  { %v4053_v2 = vpop.permute.xlu1 %203  ;;  %v285_v33 = vrot.slane %v277_v22, %v4068_v21  ;;  %v292_v41 = vrot.slane %v278_v38, %v4068_v21  ;;  %v310_v38 = vcombine.high %v253_v18, %v269_v30  ;;  %v333_v30 = vrot.slane %v325_v46, %v4081_v7 }
  0xdc   :  { %v4055_v8 = vpop.permute.xlu0 %201  ;;  %v326_v18 = vcombine.high %v260_v55, %v276_v12  ;;  %v398_v55 = vcombine.high %v3985_v27, %v4009_v40 }
  0xdf   :  { %v4057_v9 = vpop.permute.xlu1 %207 }
  0xe0   :  { %5764 = vst [vmem:[#allocation18_spill] sm:$0xff] %v4057_v9  ;;  %v4062_v14 = vpop.permute.xlu0 %205 }
  0xe3   :  { %v4065_v20 = vpop.permute.xlu1 %211 }
  0xe4   :  { %5766 = vst [vmem:[#allocation20_spill] sm:$0xff] %v4065_v20  ;;  %v4071_v54 = vpop.permute.xlu0 %209 }
  0xe5   :  { %5767 = vst [vmem:[#allocation21_spill] sm:$0xff] %v4071_v54 }
  0xe7   :  { %v224_v62 = vpop.permute.xlu1 %223 }
  0xe8   :  { %v222_v20 = vpop.permute.xlu0 %221  ;;  %v429_v54 = vcombine.low %v4037_v56, %v224_v62 }
  0xe9   :  { %v293_v23 = vcombine.low %v174_v57, %v222_v20  ;;  %v294_v39 = vcombine.high %v174_v57, %v222_v20  ;;  %v397_v57 = vcombine.low %v3985_v27, %v4009_v40 }
  0xea   :  { %v437_v22 = vrot.slane %v429_v54, %v4068_v21 }
  0xeb   :  { %v301_v49 = vrot.slane %v293_v23, %v4068_v21  ;;  %v308_v1 = vrot.slane %v294_v39, %v4068_v21  ;;  %v317_v23 = vrot.slane %v309_v25, %v4081_v7  ;;  %v405_v47 = vrot.slane %v397_v57, %v4068_v21 }
  0xec   :  { %v430_v25 = vcombine.high %v4037_v56, %v224_v62  ;;  %v414_v56 = vcombine.high %v4023_v48, %v4051_v0  ;;  %v340_v62 = vrot.slane %v326_v18, %v4081_v7  ;;  %v226_v46 = vpop.permute.xlu0 %225  ;;  %v478_v32 = vcombine.high %v421_v63, %v437_v22 }
  0xed   :  { %v341_v19 = vcombine.low %v285_v33, %v301_v49  ;;  %v357_v20 = vcombine.low %v292_v41, %v308_v1  ;;  %v342_v4 = vcombine.high %v285_v33, %v301_v49  ;;  %v358_v13 = vcombine.high %v292_v41, %v308_v1 }
  0xee   :  { %v324_v33 = vrot.slane %v310_v38, %v4081_v7  ;;  %v477_v49 = vcombine.low %v421_v63, %v437_v22  ;;  %v444_v12 = vrot.slane %v430_v25, %v4068_v21  ;;  %v396_v38 = vrot.slane %v382_v6, %v4068_v21 }
  0xef   :  { %v349_v39 = vrot.slane %v341_v19, %v4081_v7  ;;  %v365_v5 = vrot.slane %v357_v20, %v4081_v7  ;;  %v356_v52 = vrot.slane %v342_v4, %v4081_v7  ;;  %v372_v57 = vrot.slane %v358_v13, %v4081_v7 }
  0xf0   :  { %v485_v11 = vrot.slane %v477_v49, %v4081_v7  ;;  %v412_v48 = vrot.slane %v398_v55, %v4068_v21  ;;  %v428_v0 = vrot.slane %v414_v56, %v4068_v21  ;;  %v492_v63 = vrot.slane %v478_v32, %v4081_v7 }
  0xf1   :  { %v374_v9 = vcombine.high %v317_v23, %v349_v39  ;;  %v373_v54 = vcombine.low %v317_v23, %v349_v39  ;;  %v377_v15 = vcombine.low %v333_v30, %v365_v5  ;;  %v375_v19 = vcombine.low %v324_v33, %v356_v52 }
  0xf2   :  { %v379_v20 = vcombine.low %v340_v62, %v372_v57  ;;  %v376_v40 = vcombine.high %v324_v33, %v356_v52  ;;  %v446_v23 = vcombine.high %v389_v31, %v405_v47  ;;  %v565_v39 = vcombine.low %v4041_v59, %v226_v46 }
  0xf3   :  { %v1337_v41 = vsel %vm1333_vm0, %v374_v9, -inf  ;;  %v1334_v1 = vsel %vm1333_vm0, %v373_v54, -inf  ;;  %v445_v9 = vcombine.low %v389_v31, %v405_v47  ;;  %v1346_v13 = vsel %vm1333_vm0, %v377_v15, -inf }
  0xf4   :  { %1338 = vmax.xlane.f32.xlu1 %v1337_v41  ;;  %1335 = vmax.xlane.f32.xlu0 %v1334_v1  ;;  %v1340_v27 = vsel %vm1333_vm0, %v375_v19, -inf  ;;  %v1352_v54 = vsel %vm1333_vm0, %v379_v20, -inf  ;;  %v493_v22 = vcombine.low %v428_v0, %v444_v12  ;;  %v1343_v25 = vsel %vm1333_vm0, %v376_v40, -inf }
  0xf5   :  { %v453_v4 = vrot.slane %v445_v9, %v4081_v7  ;;  %v378_v52 = vcombine.high %v333_v30, %v365_v5  ;;  %v533_v33 = vcombine.low %v3979_v24, %v4013_v43  ;;  %v549_v49 = vcombine.low %v4027_v51, %v4055_v8 }
  0xf6   :  { %v460_v31 = vrot.slane %v446_v23, %v4081_v7  ;;  %v461_v47 = vcombine.low %v396_v38, %v412_v48  ;;  %v517_v41 = vcombine.low %v3851_v3, %v3999_v35  ;;  %v573_v1 = vrot.slane %v565_v39, %v4068_v21 }
  0xf7   :  { %v509_v18 = vcombine.low %v453_v4, %v485_v11  ;;  %v501_v5 = vrot.slane %v493_v22, %v4081_v7  ;;  %v494_v30 = vcombine.high %v428_v0, %v444_v12  ;;  %v1349_v19 = vsel %vm1333_vm0, %v378_v52, -inf }
  0xf8   :  { %1347 = vmax.xlane.f32.xlu1 %v1346_v13  ;;  %1341 = vmax.xlane.f32.xlu0 %v1340_v27  ;;  %v511_v6 = vcombine.low %v460_v31, %v492_v63  ;;  %v380_v55 = vcombine.high %v340_v62, %v372_v57  ;;  %v541_v56 = vrot.slane %v533_v33, %v4068_v21 }
  0xf9   :  { %v1358_v15 = vsel %vm1333_vm0, %v509_v18, -inf  ;;  %v557_v9 = vrot.slane %v549_v49, %v4068_v21  ;;  %v469_v13 = vrot.slane %v461_v47, %v4081_v7  ;;  %v462_v20 = vcombine.high %v396_v38, %v412_v48  ;;  %v228_v18 = vpop.permute.xlu1 %227 }
  0xfa   :  { %v525_v32 = vrot.slane %v517_v41, %v4068_v21  ;;  %v566_v27 = vcombine.high %v4041_v59, %v226_v46  ;;  %v1364_v40 = vsel %vm1333_vm0, %v511_v6, -inf  ;;  %v508_v12 = vrot.slane %v494_v30, %v4081_v7 }
  0xfb   :  { %v513_v23 = vcombine.low %v469_v13, %v501_v5  ;;  %v613_v0 = vcombine.low %v557_v9, %v573_v1  ;;  %v1355_v57 = vsel %vm1333_vm0, %v380_v55, -inf  ;;  %v510_v62 = vcombine.high %v453_v4, %v485_v11 }
  0xfc   :  { %1353 = vmax.xlane.f32.xlu1 %v1352_v54  ;;  %1344 = vmax.xlane.f32.xlu0 %v1343_v25  ;;  %v534_v39 = vcombine.high %v3979_v24, %v4013_v43  ;;  %v550_v38 = vcombine.high %v4027_v51, %v4055_v8  ;;  %v476_v48 = vrot.slane %v462_v20, %v4081_v7 }
  0xfd   :  { %v581_v59 = vcombine.low %v525_v32, %v541_v56  ;;  %v518_v46 = vcombine.high %v3851_v3, %v3999_v35  ;;  %v580_v54 = vrot.slane %v566_v27, %v4068_v21  ;;  %v1370_v22 = vsel %vm1333_vm0, %v513_v23, -inf }
  0xfe   :  { %v515_v25 = vcombine.low %v476_v48, %v508_v12  ;;  %v621_v11 = vrot.slane %v613_v0, %v4081_v7  ;;  %v614_v4 = vcombine.high %v557_v9, %v573_v1  ;;  %v1361_v24 = vsel %vm1333_vm0, %v510_v62, -inf }
  0xff   :  { %v512_v43 = vcombine.high %v460_v31, %v492_v63  ;;  %v548_v51 = vrot.slane %v534_v39, %v4068_v21  ;;  %v564_v8 = vrot.slane %v550_v38, %v4068_v21  ;;  %v589_v3 = vrot.slane %v581_v59, %v4081_v7 }
 0x100   :  { %1359 = vmax.xlane.f32.xlu1 %v1358_v15  ;;  %1350 = vmax.xlane.f32.xlu0 %v1349_v19  ;;  %v582_v35 = vcombine.high %v525_v32, %v541_v56  ;;  %v532_v52 = vrot.slane %v518_v46, %v4068_v21  ;;  %v701_v33 = vcombine.low %v4039_v58, %v228_v18  ;;  %v1376_v49 = vsel %vm1333_vm0, %v515_v25, -inf }
 0x101   :  { %v645_v47 = vcombine.low %v589_v3, %v621_v11  ;;  %v628_v41 = vrot.slane %v614_v4, %v4081_v7  ;;  %v629_v1 = vcombine.low %v564_v8, %v580_v54  ;;  %v653_v63 = vcombine.low %v3857_v10, %v3997_v34 }
 0x102   :  { %v1367_v31 = vsel %vm1333_vm0, %v512_v43, -inf  ;;  %v514_v15 = vcombine.high %v469_v13, %v501_v5  ;;  %v669_v6 = vcombine.low %v3983_v26, %v4011_v42  ;;  %v685_v30 = vcombine.low %v4025_v50, %v4053_v2  ;;  %v230_v43 = vpop.permute.xlu0 %229 }
 0x103   :  { %v596_v19 = vrot.slane %v582_v35, %v4081_v7  ;;  %v597_v55 = vcombine.low %v532_v52, %v548_v51  ;;  %v709_v56 = vrot.slane %v701_v33, %v4068_v21  ;;  %v1382_v9 = vsel %vm1333_vm0, %v645_v47, -inf }
 0x104   :  { %1365 = vmax.xlane.f32.xlu1 %v1364_v40  ;;  %1356 = vmax.xlane.f32.xlu0 %v1355_v57  ;;  %v637_v32 = vrot.slane %v629_v1, %v4081_v7  ;;  %v630_v27 = vcombine.high %v564_v8, %v580_v54  ;;  %v661_v5 = vrot.slane %v653_v63, %v4068_v21  ;;  %v1373_v13 = vsel %vm1333_vm0, %v514_v15, -inf }
 0x105   :  { %v647_v20 = vcombine.low %v596_v19, %v628_v41  ;;  %v516_v40 = vcombine.high %v476_v48, %v508_v12  ;;  %v677_v23 = vrot.slane %v669_v6, %v4068_v21  ;;  %v693_v0 = vrot.slane %v685_v30, %v4068_v21 }
 0x106   :  { %v605_v57 = vrot.slane %v597_v55, %v4081_v7  ;;  %v598_v62 = vcombine.high %v532_v52, %v548_v51  ;;  %v702_v39 = vcombine.high %v4039_v58, %v228_v18  ;;  %v644_v46 = vrot.slane %v630_v27, %v4081_v7 }
 0x107   :  { %v1388_v38 = vsel %vm1333_vm0, %v647_v20, -inf  ;;  %v749_v54 = vcombine.low %v693_v0, %v709_v56  ;;  %v1379_v12 = vsel %vm1333_vm0, %v516_v40, -inf  ;;  %v646_v48 = vcombine.high %v589_v3, %v621_v11 }
 0x108   :  { %1371 = vmax.xlane.f32.xlu1 %v1370_v22  ;;  %1362 = vmax.xlane.f32.xlu0 %v1361_v24  ;;  %v649_v59 = vcombine.low %v605_v57, %v637_v32  ;;  %v654_v22 = vcombine.high %v3857_v10, %v3997_v34  ;;  %v670_v25 = vcombine.high %v3983_v26, %v4011_v42 }
 0x109   :  { %v686_v4 = vcombine.high %v4025_v50, %v4053_v2  ;;  %v612_v58 = vrot.slane %v598_v62, %v4081_v7  ;;  %v717_v18 = vcombine.low %v661_v5, %v677_v23  ;;  %v716_v24 = vrot.slane %v702_v39, %v4068_v21 }
 0x10a   :  { %v1394_v51 = vsel %vm1333_vm0, %v649_v59, -inf  ;;  %v757_v34 = vrot.slane %v749_v54, %v4081_v7  ;;  %v750_v8 = vcombine.high %v693_v0, %v709_v56  ;;  %v668_v11 = vrot.slane %v654_v22, %v4068_v21 }
 0x10b   :  { %v651_v10 = vcombine.low %v612_v58, %v644_v46  ;;  %v1385_v26 = vsel %vm1333_vm0, %v646_v48, -inf  ;;  %v648_v42 = vcombine.high %v596_v19, %v628_v41  ;;  %v684_v50 = vrot.slane %v670_v25, %v4068_v21 }
 0x10c   :  { %1377 = vmax.xlane.f32.xlu1 %v1376_v49  ;;  %1368 = vmax.xlane.f32.xlu0 %v1367_v31  ;;  %v700_v2 = vrot.slane %v686_v4, %v4068_v21  ;;  %v725_v3 = vrot.slane %v717_v18, %v4081_v7  ;;  %v718_v35 = vcombine.high %v661_v5, %v677_v23  ;;  %v232_v18 = vpop.permute.xlu1 %231 }
 0x10d   :  { %v837_v52 = vcombine.low %v4045_v61, %v230_v43  ;;  %v1400_v33 = vsel %vm1333_vm0, %v651_v10, -inf  ;;  %v764_v47 = vrot.slane %v750_v8, %v4081_v7  ;;  %v1391_v63 = vsel %vm1333_vm0, %v648_v42, -inf }
 0x10e   :  { %v781_v49 = vcombine.low %v725_v3, %v757_v34  ;;  %v765_v1 = vcombine.low %v700_v2, %v716_v24  ;;  %v650_v41 = vcombine.high %v605_v57, %v637_v32  ;;  %v805_v31 = vcombine.low %v3989_v29, %v4017_v45 }
 0x10f   :  { %v821_v15 = vcombine.low %v4031_v53, %v4062_v14  ;;  %v732_v6 = vrot.slane %v718_v35, %v4081_v7  ;;  %v733_v30 = vcombine.low %v668_v11, %v684_v50  ;;  %v789_v19 = vcombine.low %v3869_v17, %v4003_v37 }
 0x110   :  { %1383 = vmax.xlane.f32.xlu1 %v1382_v9  ;;  %1374 = vmax.xlane.f32.xlu0 %v1373_v13  ;;  %v845_v55 = vrot.slane %v837_v52, %v4068_v21  ;;  %v1406_v56 = vsel %vm1333_vm0, %v781_v49, -inf  ;;  %v773_v20 = vrot.slane %v765_v1, %v4081_v7  ;;  %v766_v32 = vcombine.high %v700_v2, %v716_v24  ;;  %v5769_v49 = vld [vmem:[#allocation13_spill] sm:$0xff] }
 0x111   :  { %v783_v9 = vcombine.low %v732_v6, %v764_v47  ;;  %v1397_v27 = vsel %vm1333_vm0, %v650_v41, -inf  ;;  %v652_v5 = vcombine.high %v612_v58, %v644_v46  ;;  %v813_v13 = vrot.slane %v805_v31, %v4068_v21 }
 0x112   :  { %v829_v40 = vrot.slane %v821_v15, %v4068_v21  ;;  %v741_v23 = vrot.slane %v733_v30, %v4081_v7  ;;  %v734_v0 = vcombine.high %v668_v11, %v684_v50  ;;  %v797_v57 = vrot.slane %v789_v19, %v4068_v21 }
 0x113   :  { %v838_v62 = vcombine.high %v4045_v61, %v230_v43  ;;  %v1412_v39 = vsel %vm1333_vm0, %v783_v9, -inf  ;;  %v780_v59 = vrot.slane %v766_v32, %v4081_v7  ;;  %v1403_v46 = vsel %vm1333_vm0, %v652_v5, -inf }
 0x114   :  { %1389 = vmax.xlane.f32.xlu1 %v1388_v38  ;;  %1380 = vmax.xlane.f32.xlu0 %v1379_v12  ;;  %v785_v38 = vcombine.low %v741_v23, %v773_v20  ;;  %v885_v54 = vcombine.low %v829_v40, %v845_v55  ;;  %v782_v22 = vcombine.high %v725_v3, %v757_v34 }
 0x115   :  { %v806_v12 = vcombine.high %v3989_v29, %v4017_v45  ;;  %v822_v48 = vcombine.high %v4031_v53, %v4062_v14  ;;  %v748_v25 = vrot.slane %v734_v0, %v4081_v7  ;;  %v853_v61 = vcombine.low %v797_v57, %v813_v13 }
 0x116   :  { %v790_v4 = vcombine.high %v3869_v17, %v4003_v37  ;;  %v852_v58 = vrot.slane %v838_v62, %v4068_v21  ;;  %v1418_v24 = vsel %vm1333_vm0, %v785_v38, -inf  ;;  %v886_v10 = vcombine.high %v829_v40, %v845_v55 }
 0x117   :  { %v787_v43 = vcombine.low %v748_v25, %v780_v59  ;;  %v1409_v29 = vsel %vm1333_vm0, %v782_v22, -inf  ;;  %v784_v45 = vcombine.high %v732_v6, %v764_v47  ;;  %v820_v53 = vrot.slane %v806_v12, %v4068_v21 }
 0x118   :  { %1395 = vmax.xlane.f32.xlu1 %v1394_v51  ;;  %1386 = vmax.xlane.f32.xlu0 %v1385_v26  ;;  %v893_v51 = vrot.slane %v885_v54, %v4081_v7  ;;  %v836_v14 = vrot.slane %v822_v48, %v4068_v21  ;;  %v861_v17 = vrot.slane %v853_v61, %v4081_v7 }
 0x119   :  { %v854_v37 = vcombine.high %v797_v57, %v813_v13  ;;  %v804_v34 = vrot.slane %v790_v4, %v4068_v21  ;;  %v973_v8 = vcombine.low %v4043_v60, %v232_v18  ;;  %v1424_v11 = vsel %vm1333_vm0, %v787_v43, -inf  ;;  %v234_v4 = vpop.permute.xlu0 %233  ;;  %v5770_v43 = vld [vmem:[#allocation17_spill] sm:$0xff] }
 0x11a   :  { %v917_v26 = vcombine.low %v861_v17, %v893_v51  ;;  %v900_v42 = vrot.slane %v886_v10, %v4081_v7  ;;  %v901_v50 = vcombine.low %v836_v14, %v852_v58  ;;  %v925_v2 = vcombine.low %v3865_v16, %v4001_v36 }
 0x11b   :  { %v1415_v3 = vsel %vm1333_vm0, %v784_v45, -inf  ;;  %v786_v35 = vcombine.high %v741_v23, %v773_v20  ;;  %v941_v52 = vcombine.low %v3987_v28, %v4015_v44  ;;  %v868_v1 = vrot.slane %v854_v37, %v4081_v7  ;;  %v5771_v37 = vld [vmem:[#allocation12_spill] sm:$0xff] }
 0x11c   :  { %1401 = vmax.xlane.f32.xlu1 %v1400_v33  ;;  %1392 = vmax.xlane.f32.xlu0 %v1391_v63  ;;  %v5768_v33 = vld [vmem:[#allocation18_spill] sm:$0xff]  ;;  %v869_v63 = vcombine.low %v804_v34, %v820_v53  ;;  %v981_v41 = vrot.slane %v973_v8, %v4068_v21  ;;  %v1430_v31 = vsel %vm1333_vm0, %v917_v26, -inf  ;;  %v909_v6 = vrot.slane %v901_v50, %v4081_v7  ;;  %v5774_v26 = vld [vmem:[#allocation15_spill] sm:$0xff] }
 0x11d   :  { %v957_v47 = vcombine.low %v5769_v49, %v5768_v33  ;;  %v919_v15 = vcombine.low %v868_v1, %v900_v42  ;;  %v902_v30 = vcombine.high %v836_v14, %v852_v58  ;;  %v933_v19 = vrot.slane %v925_v2, %v4068_v21  ;;  %v5775_v2 = vld [vmem:[#allocation10_spill] sm:$0xff] }
 0x11e   :  { %v1421_v55 = vsel %vm1333_vm0, %v786_v35, -inf  ;;  %v949_v9 = vrot.slane %v941_v52, %v4068_v21  ;;  %v877_v32 = vrot.slane %v869_v63, %v4081_v7  ;;  %v974_v5 = vcombine.high %v4043_v60, %v232_v18 }
 0x11f   :  { %v965_v20 = vrot.slane %v957_v47, %v4068_v21  ;;  %v1436_v13 = vsel %vm1333_vm0, %v919_v15, -inf  ;;  %v916_v23 = vrot.slane %v902_v30, %v4081_v7  ;;  %v958_v57 = vcombine.high %v5769_v49, %v5768_v33 }
 0x120   :  { %1407 = vmax.xlane.f32.xlu1 %v1406_v56  ;;  %1398 = vmax.xlane.f32.xlu0 %v1397_v27  ;;  %v788_v56 = vcombine.high %v748_v25, %v780_v59  ;;  %v870_v27 = vcombine.high %v804_v34, %v820_v53  ;;  %v921_v40 = vcombine.low %v877_v32, %v909_v6  ;;  %v5772_v34 = vld [vmem:[#allocation8_spill] sm:$0xff] }
 0x121   :  { %v1021_v0 = vcombine.low %v965_v20, %v981_v41  ;;  %v926_v38 = vcombine.high %v3865_v16, %v4001_v36  ;;  %v942_v59 = vcombine.high %v3987_v28, %v4015_v44  ;;  %v989_v54 = vcombine.low %v933_v19, %v949_v9 }
 0x122   :  { %v1427_v62 = vsel %vm1333_vm0, %v788_v56, -inf  ;;  %v884_v60 = vrot.slane %v870_v27, %v4081_v7  ;;  %v1442_v22 = vsel %vm1333_vm0, %v921_v40, -inf  ;;  %v1022_v25 = vcombine.high %v965_v20, %v981_v41 }
 0x123   :  { %v1029_v48 = vrot.slane %v1021_v0, %v4081_v7  ;;  %v972_v61 = vrot.slane %v958_v57, %v4068_v21  ;;  %v920_v36 = vcombine.high %v868_v1, %v900_v42  ;;  %v940_v28 = vrot.slane %v926_v38, %v4068_v21 }
 0x124   :  { %1413 = vmax.xlane.f32.xlu1 %v1412_v39  ;;  %1404 = vmax.xlane.f32.xlu0 %v1403_v46  ;;  %v918_v39 = vcombine.high %v861_v17, %v893_v51  ;;  %v988_v46 = vrot.slane %v974_v5, %v4068_v21  ;;  %v923_v12 = vcombine.low %v884_v60, %v916_v23 }
 0x125   :  { %v956_v44 = vrot.slane %v942_v59, %v4068_v21  ;;  %v997_v58 = vrot.slane %v989_v54, %v4081_v7  ;;  %v990_v18 = vcombine.high %v933_v19, %v949_v9  ;;  %v1109_v51 = vcombine.low %v5770_v43, %v234_v4 }
 0x126   :  { %v1433_v16 = vsel %vm1333_vm0, %v918_v39, -inf  ;;  %v1448_v10 = vsel %vm1333_vm0, %v923_v12, -inf  ;;  %v1036_v45 = vrot.slane %v1022_v25, %v4081_v7  ;;  %v1439_v53 = vsel %vm1333_vm0, %v920_v36, -inf  ;;  %v236_v39 = vpop.permute.xlu1 %235 }
 0x127   :  { %v922_v14 = vcombine.high %v877_v32, %v909_v6  ;;  %v1005_v17 = vcombine.low %v940_v28, %v956_v44  ;;  %v1077_v8 = vcombine.low %v5772_v34, %v5771_v37  ;;  %v1004_v50 = vrot.slane %v990_v18, %v4081_v7 }
 0x128   :  { %1419 = vmax.xlane.f32.xlu1 %v1418_v24  ;;  %1410 = vmax.xlane.f32.xlu0 %v1409_v29  ;;  %v1037_v24 = vcombine.low %v972_v61, %v988_v46  ;;  %v1053_v29 = vcombine.low %v997_v58, %v1029_v48  ;;  %v1038_v52 = vcombine.high %v972_v61, %v988_v46 }
 0x129   :  { %v1117_v33 = vrot.slane %v1109_v51, %v4068_v21  ;;  %v1055_v47 = vcombine.low %v1004_v50, %v1036_v45  ;;  %v1445_v63 = vsel %vm1333_vm0, %v922_v14, -inf  ;;  %v924_v41 = vcombine.high %v884_v60, %v916_v23 }
 0x12a   :  { %v1454_v49 = vsel %vm1333_vm0, %v1053_v29, -inf  ;;  %v1045_v1 = vrot.slane %v1037_v24, %v4081_v7  ;;  %v1085_v15 = vrot.slane %v1077_v8, %v4068_v21  ;;  %v1013_v30 = vrot.slane %v1005_v17, %v4081_v7  ;;  %v5778_v24 = vld [vmem:[#allocation9_spill] sm:$0xff] }
 0x12b   :  { %v1460_v9 = vsel %vm1333_vm0, %v1055_v47, -inf  ;;  %v1052_v32 = vrot.slane %v1038_v52, %v4081_v7  ;;  %v1451_v27 = vsel %vm1333_vm0, %v924_v41, -inf  ;;  %v1054_v5 = vcombine.high %v997_v58, %v1029_v48 }
 0x12c   :  { %1425 = vmax.xlane.f32.xlu1 %v1424_v11  ;;  %1416 = vmax.xlane.f32.xlu0 %v1415_v3  ;;  %v5773_v11 = vld [vmem:[#allocation21_spill] sm:$0xff]  ;;  %v5776_v3 = vld [vmem:[#allocation6_spill] sm:$0xff]  ;;  %v1057_v20 = vcombine.low %v1013_v30, %v1045_v1  ;;  %v1058_v29 = vcombine.high %v1013_v30, %v1045_v1 }
 0x12d   :  { %v1093_v42 = vcombine.low %v5774_v26, %v5773_v11  ;;  %v1061_v35 = vcombine.low %v5776_v3, %v5775_v2  ;;  %v1094_v23 = vcombine.high %v5774_v26, %v5773_v11  ;;  %v1062_v57 = vcombine.high %v5776_v3, %v5775_v2 }
 0x12e   :  { %v1466_v59 = vsel %vm1333_vm0, %v1057_v20, -inf  ;;  %v1457_v46 = vsel %vm1333_vm0, %v1054_v5, -inf  ;;  %v1469_v52 = vsel %vm1333_vm0, %v1058_v29, -inf }
 0x12f   :  { %v1101_v6 = vrot.slane %v1093_v42, %v4068_v21  ;;  %v1069_v19 = vrot.slane %v1061_v35, %v4068_v21  ;;  %v1108_v25 = vrot.slane %v1094_v23, %v4068_v21 }
 0x130   :  { %1431 = vmax.xlane.f32.xlu1 %v1430_v31  ;;  %1422 = vmax.xlane.f32.xlu0 %v1421_v55  ;;  %v1006_v31 = vcombine.high %v940_v28, %v956_v44  ;;  %v1110_v55 = vcombine.high %v5770_v43, %v234_v4  ;;  %v1076_v4 = vrot.slane %v1062_v57, %v4068_v21  ;;  %v5779_v43 = vld [vmem:[#allocation5_spill] sm:$0xff] }
 0x131   :  { %v1157_v56 = vcombine.low %v1101_v6, %v1117_v33  ;;  %v1125_v40 = vcombine.low %v1069_v19, %v1085_v15  ;;  %v1158_v38 = vcombine.high %v1101_v6, %v1117_v33  ;;  %v1126_v48 = vcombine.high %v1069_v19, %v1085_v15 }
 0x132   :  { %v1020_v0 = vrot.slane %v1006_v31, %v4081_v7  ;;  %v1197_v51 = vcombine.low %v5779_v43, %v5778_v24  ;;  %v1198_v19 = vcombine.high %v5779_v43, %v5778_v24 }
 0x133   :  { %v1165_v54 = vrot.slane %v1157_v56, %v4081_v7  ;;  %v1133_v61 = vrot.slane %v1125_v40, %v4081_v7  ;;  %v1172_v18 = vrot.slane %v1158_v38, %v4081_v7  ;;  %v1140_v11 = vrot.slane %v1126_v48, %v4081_v7 }
 0x134   :  { %1437 = vmax.xlane.f32.xlu1 %v1436_v13  ;;  %1428 = vmax.xlane.f32.xlu0 %v1427_v62  ;;  %v1078_v13 = vcombine.high %v5772_v34, %v5771_v37  ;;  %v1124_v62 = vrot.slane %v1110_v55, %v4068_v21  ;;  %v1059_v60 = vcombine.low %v1020_v0, %v1052_v32  ;;  %v5782_v37 = vld [vmem:[#allocation20_spill] sm:$0xff]  ;;  %v5783_v34 = vld [vmem:[#allocation14_spill] sm:$0xff] }
 0x135   :  { %v1189_v58 = vcombine.low %v1133_v61, %v1165_v54  ;;  %v1229_v8 = vcombine.low %v5783_v34, %v5782_v37  ;;  %v1191_v2 = vcombine.low %v1140_v11, %v1172_v18  ;;  %v1205_v35 = vrot.slane %v1197_v51, %v4068_v21 }
 0x136   :  { %v1092_v12 = vrot.slane %v1078_v13, %v4068_v21  ;;  %v1173_v28 = vcombine.low %v1108_v25, %v1124_v62  ;;  %v1472_v44 = vsel %vm1333_vm0, %v1059_v60, -inf  ;;  %v1174_v42 = vcombine.high %v1108_v25, %v1124_v62 }
 0x137   :  { %v1060_v33 = vcombine.high %v1020_v0, %v1052_v32  ;;  %v1237_v1 = vrot.slane %v1229_v8, %v4068_v21  ;;  %v1484_v15 = vsel %vm1333_vm0, %v1191_v2, -inf  ;;  %v1190_v56 = vcombine.high %v1133_v61, %v1165_v54 }
 0x138   :  { %1443 = vmax.xlane.f32.xlu1 %v1442_v22  ;;  %1434 = vmax.xlane.f32.xlu0 %v1433_v16  ;;  %v1056_v22 = vcombine.high %v1004_v50, %v1036_v45  ;;  %v5777_v16 = vld [vmem:[#allocation16_spill] sm:$0xff]  ;;  %v5780_v45 = vld [vmem:[#allocation11_spill] sm:$0xff]  ;;  %v1141_v17 = vcombine.low %v1076_v4, %v1092_v12  ;;  %v1478_v50 = vsel %vm1333_vm0, %v1189_v58, -inf  ;;  %v1181_v3 = vrot.slane %v1173_v28, %v4081_v7 }
 0x139   :  { %v1245_v36 = vcombine.low %v5777_v16, %v236_v39  ;;  %v1142_v47 = vcombine.high %v1076_v4, %v1092_v12  ;;  %v1246_v41 = vcombine.high %v5777_v16, %v236_v39  ;;  %v1188_v30 = vrot.slane %v1174_v42, %v4081_v7 }
 0x13a   :  { %v1475_v55 = vsel %vm1333_vm0, %v1060_v33, -inf  ;;  %v1230_v32 = vcombine.high %v5783_v34, %v5782_v37  ;;  %v1212_v57 = vrot.slane %v1198_v19, %v4068_v21  ;;  %v1481_v62 = vsel %vm1333_vm0, %v1190_v56, -inf  ;;  %v3771_v33 = vld [vmem:[#allocation2 + $0x1] ss:$2 sm:$0xff]  ;;  %v3777_v56 = vld [vmem:[#allocation2 + $0x51] ss:$2 sm:$0xff] }
 0x13b   :  { %v1253_v26 = vrot.slane %v1245_v36, %v4068_v21  ;;  %v1260_v5 = vrot.slane %v1246_v41, %v4068_v21  ;;  %v1192_v39 = vcombine.high %v1140_v11, %v1172_v18 }
 0x13c   :  { %1449 = vmax.xlane.f32.xlu1 %v1448_v10  ;;  %1440 = vmax.xlane.f32.xlu0 %v1439_v53  ;;  %v1463_v10 = vsel %vm1333_vm0, %v1056_v22, -inf  ;;  %v5781_v53 = vld [vmem:[#allocation7_spill] sm:$0xff]  ;;  %v1244_v60 = vrot.slane %v1230_v32, %v4068_v21 }
 0x13d   :  { %v1213_v14 = vcombine.low %v5781_v53, %v5780_v45  ;;  %v1293_v31 = vcombine.low %v1237_v1, %v1253_v26  ;;  %v1294_v13 = vcombine.high %v1237_v1, %v1253_v26  ;;  %v1487_v25 = vsel %vm1333_vm0, %v1192_v39, -inf  ;;  %v3773_v1 = vld [vmem:[#allocation2 + $0x21] ss:$2 sm:$0xff]  ;;  %v3778_v32 = vld [vmem:[#allocation2 + $0x10] ss:$2 sm:$0xff] }
 0x13e   :  { %v1310_v36 = vcombine.high %v1244_v60, %v1260_v5  ;;  %v3783_v39 = vld [vmem:[#allocation2 + $0x41] ss:$2 sm:$0xff] }
 0x13f   :  { %v1301_v0 = vrot.slane %v1293_v31, %v4081_v7  ;;  %v1308_v48 = vrot.slane %v1294_v13, %v4081_v7  ;;  %v3774_v31 = vld [vmem:[#allocation2 + $0x30] ss:$2 sm:$0xff] }
 0x140   :  { %1455 = vmax.xlane.f32.xlu1 %v1454_v49  ;;  %1446 = vmax.xlane.f32.xlu0 %v1445_v63  ;;  %v1221_v49 = vrot.slane %v1213_v14, %v4068_v21  ;;  %v1149_v63 = vrot.slane %v1141_v17, %v4081_v7 }
 0x142   :  { %v1193_v6 = vcombine.low %v1149_v63, %v1181_v3  ;;  %v1261_v20 = vcombine.low %v1205_v35, %v1221_v49  ;;  %v1194_v61 = vcombine.high %v1149_v63, %v1181_v3 }
 0x144   :  { %1461 = vmax.xlane.f32.xlu1 %v1460_v9  ;;  %1452 = vmax.xlane.f32.xlu0 %v1451_v27  ;;  %v1214_v9 = vcombine.high %v5781_v53, %v5780_v45  ;;  %v1156_v27 = vrot.slane %v1142_v47, %v4081_v7  ;;  %v1490_v40 = vsel %vm1333_vm0, %v1193_v6, -inf  ;;  %v1269_v54 = vrot.slane %v1261_v20, %v4081_v7  ;;  %v3772_v47 = vld [vmem:[#allocation2 + $0x20] ss:$2 sm:$0xff] }
 0x145   :  { %v1493_v18 = vsel %vm1333_vm0, %v1194_v61, -inf  ;;  %v1324_v45 = vrot.slane %v1310_v36, %v4081_v7  ;;  %v4372_v63 = vadd.f32 %v3773_v1, %v3772_v47 }
 0x146   :  { %v1195_v23 = vcombine.low %v1156_v27, %v1188_v30  ;;  %v1228_v38 = vrot.slane %v1214_v9, %v4068_v21  ;;  %v1325_v12 = vcombine.low %v1269_v54, %v1301_v0  ;;  %v1196_v24 = vcombine.high %v1156_v27, %v1188_v30  ;;  %v3779_v27 = vld [vmem:[#allocation2 + $0x11] ss:$2 sm:$0xff] }
 0x147   :  { %v1326_v14 = vcombine.high %v1269_v54, %v1301_v0  ;;  %5785 = vst [vmem:[#allocation13_spill] sm:$0xff] %v4372_v63  ;;  %v3784_v54 = vld [vmem:[#allocation2 + $0x60] ss:$2 sm:$0xff] }
 0x148   :  { %1467 = vmax.xlane.f32.xlu1 %v1466_v59  ;;  %1458 = vmax.xlane.f32.xlu0 %v1457_v46  ;;  %v1262_v59 = vcombine.high %v1205_v35, %v1221_v49  ;;  %v1309_v46 = vcombine.low %v1244_v60, %v1260_v5  ;;  %v1496_v22 = vsel %vm1333_vm0, %v1195_v23, -inf  ;;  %v1277_v4 = vcombine.low %v1212_v57, %v1228_v38  ;;  %v3781_v23 = vld [vmem:[#allocation2 + $0x71] ss:$2 sm:$0xff] }
 0x149   :  { %v1502_v28 = vsel %vm1333_vm0, %v1325_v12, -inf  ;;  %v1278_v43 = vcombine.high %v1212_v57, %v1228_v38  ;;  %v1499_v53 = vsel %vm1333_vm0, %v1196_v24, -inf  ;;  %v1505_v8 = vsel %vm1333_vm0, %v1326_v14, -inf }
 0x14a   :  { %v1276_v16 = vrot.slane %v1262_v59, %v4081_v7  ;;  %v1317_v58 = vrot.slane %v1309_v46, %v4081_v7  ;;  %v1285_v51 = vrot.slane %v1277_v4, %v4081_v7  ;;  %v4390_v5 = vadd.f32 %v3779_v27, %v3778_v32  ;;  %v3785_v46 = vld [vmem:[#allocation2 + $0x61] ss:$2 sm:$0xff] }
 0x14b   :  { %v1292_v17 = vrot.slane %v1278_v43, %v4081_v7 }
 0x14c   :  { %1473 = vmax.xlane.f32.xlu1 %v1472_v44  ;;  %1464 = vmax.xlane.f32.xlu0 %v1463_v10  ;;  %v1327_v44 = vcombine.low %v1276_v16, %v1308_v48  ;;  %v1329_v29 = vcombine.low %v1285_v51, %v1317_v58  ;;  %v1328_v11 = vcombine.high %v1276_v16, %v1308_v48 }
 0x14d   :  { %v1331_v34 = vcombine.low %v1292_v17, %v1324_v45  ;;  %v1332_v3 = vcombine.high %v1292_v17, %v1324_v45  ;;  %5792 = vst [vmem:[#allocation6_spill] sm:$0xff] %v4390_v5 }
 0x14e   :  { %v1508_v10 = vsel %vm1333_vm0, %v1327_v44, -inf  ;;  %v1514_v37 = vsel %vm1333_vm0, %v1329_v29, -inf  ;;  %v1511_v42 = vsel %vm1333_vm0, %v1328_v11, -inf }
 0x14f   :  { %v1520_v26 = vsel %vm1333_vm0, %v1331_v34, -inf  ;;  %v1523_v35 = vsel %vm1333_vm0, %v1332_v3, -inf }
 0x150   :  { %1479 = vmax.xlane.f32.xlu1 %v1478_v50  ;;  %1470 = vmax.xlane.f32.xlu0 %v1469_v52  ;;  %v1330_v50 = vcombine.high %v1285_v51, %v1317_v58  ;;  %v3770_v52 = vld [vmem:[#allocation2] ss:$2 sm:$0xff] }
 0x151   :  { %v4368_v49 = vadd.f32 %v3771_v33, %v3770_v52 }
 0x152   :  { %v1517_v2 = vsel %vm1333_vm0, %v1330_v50, -inf }
 0x153   :  { %5784 = vst [vmem:[#allocation18_spill] sm:$0xff] %v4368_v49 }
 0x154   :  { %1485 = vmax.xlane.f32.xlu1 %v1484_v15  ;;  %1476 = vmax.xlane.f32.xlu0 %v1475_v55  ;;  %v3775_v15 = vld [vmem:[#allocation2 + $0x31] ss:$2 sm:$0xff]  ;;  %v3776_v55 = vld [vmem:[#allocation2 + $0x50] ss:$2 sm:$0xff] }
 0x155   :  { %v4378_v6 = vadd.f32 %v3775_v15, %v3774_v31  ;;  %v4386_v9 = vadd.f32 %v3777_v56, %v3776_v55 }
 0x157   :  { %5787 = vst [vmem:[#allocation12_spill] sm:$0xff] %v4378_v6  ;;  %5790 = vst [vmem:[#allocation15_spill] sm:$0xff] %v4386_v9 }
 0x158   :  { %1491 = vmax.xlane.f32.xlu1 %v1490_v40  ;;  %1482 = vmax.xlane.f32.xlu0 %v1481_v62  ;;  %v3780_v40 = vld [vmem:[#allocation2 + $0x70] ss:$2 sm:$0xff]  ;;  %v3782_v62 = vld [vmem:[#allocation2 + $0x40] ss:$2 sm:$0xff] }
 0x159   :  { %v4396_v0 = vadd.f32 %v3781_v23, %v3780_v40  ;;  %v4402_v38 = vadd.f32 %v3783_v39, %v3782_v62 }
 0x15b   :  { %5794 = vst [vmem:[#allocation9_spill] sm:$0xff] %v4396_v0  ;;  %5796 = vst [vmem:[#allocation11_spill] sm:$0xff] %v4402_v38 }
 0x15c   :  { %1497 = vmax.xlane.f32.xlu1 %v1496_v22  ;;  %1488 = vmax.xlane.f32.xlu0 %v1487_v25  ;;  %v4412_v22 = vadd.f32 %v3785_v46, %v3784_v54 }
 0x160   :  { %1503 = vmax.xlane.f32.xlu1 %v1502_v28  ;;  %1494 = vmax.xlane.f32.xlu0 %v1493_v18 }
 0x164   :  { %1509 = vmax.xlane.f32.xlu1 %v1508_v10  ;;  %1500 = vmax.xlane.f32.xlu0 %v1499_v53 }
 0x168   :  { %1515 = vmax.xlane.f32.xlu1 %v1514_v37  ;;  %1506 = vmax.xlane.f32.xlu0 %v1505_v8 }
 0x16c   :  { %1521 = vmax.xlane.f32.xlu1 %v1520_v26  ;;  %1512 = vmax.xlane.f32.xlu0 %v1511_v42 }
 0x170   :  { %1518 = vmax.xlane.f32.xlu0 %v1517_v2 }
 0x174   :  { %1524 = vmax.xlane.f32.xlu0 %v1523_v35 }
 0x17d   :  { %1534 = vrot.lane.b32.xlu1 %v4368_v49, %s3813_s20 }
 0x181   :  { %v4374_v41 = vpop.xlane.xlu1 %1338  ;;  %1538 = vrot.lane.b32.xlu1 %v4372_v63, %s3813_s20  ;;  %v4380_v30 = vpop.xlane.xlu0 %1335 }
 0x182   :  { %5786 = vst [vmem:[#allocation17_spill] sm:$0xff] %v4374_v41  ;;  %5788 = vst [vmem:[#allocation8_spill] sm:$0xff] %v4380_v30 }
 0x185   :  { %v4382_v19 = vpop.xlane.xlu1 %1347  ;;  %1540 = vrot.lane.b32.xlu1 %v4378_v6, %s3813_s20  ;;  %v4388_v20 = vpop.xlane.xlu0 %1341 }
 0x186   :  { %5789 = vst [vmem:[#allocation21_spill] sm:$0xff] %v4382_v19  ;;  %5791 = vst [vmem:[#allocation10_spill] sm:$0xff] %v4388_v20 }
 0x189   :  { %v4392_v13 = vpop.xlane.xlu1 %1353  ;;  %1544 = vrot.lane.b32.xlu1 %v4386_v9, %s3813_s20  ;;  %v4398_v57 = vpop.xlane.xlu0 %1344 }
 0x18a   :  { %5793 = vst [vmem:[#allocation16_spill] sm:$0xff] %v4392_v13  ;;  %5795 = vst [vmem:[#allocation5_spill] sm:$0xff] %v4398_v57  ;;  %1536 = vrot.lane.b32.xlu0 %v4390_v5, %s3813_s20 }
 0x18d   :  { %v4404_v59 = vpop.xlane.xlu1 %1359  ;;  %1548 = vrot.lane.b32.xlu1 %v4396_v0, %s3813_s20  ;;  %v4408_v60 = vpop.xlane.xlu0 %1350 }
 0x18e   :  { %5797 = vst [vmem:[#allocation7_spill] sm:$0xff] %v4404_v59  ;;  %5798 = vst [vmem:[#allocation20_spill] sm:$0xff] %v4408_v60  ;;  %1542 = vrot.lane.b32.xlu0 %v4402_v38, %s3813_s20 }
 0x191   :  { %v4414_v12 = vpop.xlane.xlu1 %1365  ;;  %1560 = vrot.lane.b32.xlu1 %v4390_v5, %s3814_s0  ;;  %v4418_v48 = vpop.xlane.xlu0 %1356 }
 0x192   :  { %5799 = vst [vmem:[#allocation14_spill] sm:$0xff] %v4414_v12  ;;  %5800 = vst [vmem:[#allocation22_spill] sm:$0xff] %v4418_v48  ;;  %1546 = vrot.lane.b32.xlu0 %v4412_v22, %s3813_s20 }
 0x195   :  { %v4422_v25 = vpop.xlane.xlu1 %1371  ;;  %1564 = vrot.lane.b32.xlu1 %v4378_v6, %s3814_s0  ;;  %v4426_v61 = vpop.xlane.xlu0 %1362 }
 0x196   :  { %5801 = vst [vmem:[#allocation23_spill] sm:$0xff] %v4422_v25  ;;  %5802 = vst [vmem:[#allocation24_spill] sm:$0xff] %v4426_v61  ;;  %1558 = vrot.lane.b32.xlu0 %v4368_v49, %s3814_s0 }
 0x199   :  { %v4430_v4 = vpop.xlane.xlu1 %1377  ;;  %1568 = vrot.lane.b32.xlu1 %v4386_v9, %s3814_s0  ;;  %v4434_v16 = vpop.xlane.xlu0 %1368 }
 0x19a   :  { %5803 = vst [vmem:[#allocation25_spill] sm:$0xff] %v4430_v4  ;;  %5804 = vst [vmem:[#allocation26_spill] sm:$0xff] %v4434_v16  ;;  %1562 = vrot.lane.b32.xlu0 %v4372_v63, %s3814_s0 }
 0x19d   :  { %v4438_v36 = vpop.xlane.xlu1 %1383  ;;  %1572 = vrot.lane.b32.xlu1 %v4396_v0, %s3814_s0  ;;  %v4442_v28 = vpop.xlane.xlu0 %1374 }
 0x19e   :  { %5805 = vst [vmem:[#allocation27_spill] sm:$0xff] %v4438_v36  ;;  %5806 = vst [vmem:[#allocation28_spill] sm:$0xff] %v4442_v28  ;;  %1566 = vrot.lane.b32.xlu0 %v4402_v38, %s3814_s0 }
 0x1a1   :  { %v4446_v44 = vpop.xlane.xlu1 %1389  ;;  %1584 = vrot.lane.b32.xlu1 %v4390_v5, %s3815_s21  ;;  %v4450_v58 = vpop.xlane.xlu0 %1380 }
 0x1a2   :  { %5807 = vst [vmem:[#allocation29_spill] sm:$0xff] %v4446_v44  ;;  %5808 = vst [vmem:[#allocation30_spill] sm:$0xff] %v4450_v58  ;;  %1570 = vrot.lane.b32.xlu0 %v4412_v22, %s3814_s0 }
 0x1a5   :  { %v4454_v18 = vpop.xlane.xlu1 %1395  ;;  %1588 = vrot.lane.b32.xlu1 %v4378_v6, %s3815_s21  ;;  %v4458_v24 = vpop.xlane.xlu0 %1386 }
 0x1a6   :  { %5809 = vst [vmem:[#allocation31_spill] sm:$0xff] %v4454_v18  ;;  %5810 = vst [vmem:[#allocation32_spill] sm:$0xff] %v4458_v24  ;;  %1582 = vrot.lane.b32.xlu0 %v4368_v49, %s3815_s21 }
 0x1a9   :  { %v4462_v43 = vpop.xlane.xlu1 %1401  ;;  %1592 = vrot.lane.b32.xlu1 %v4386_v9, %s3815_s21  ;;  %v4466_v51 = vpop.xlane.xlu0 %1392 }
 0x1aa   :  { %5811 = vst [vmem:[#allocation33_spill] sm:$0xff] %v4462_v43  ;;  %5812 = vst [vmem:[#allocation34_spill] sm:$0xff] %v4466_v51  ;;  %1586 = vrot.lane.b32.xlu0 %v4372_v63, %s3815_s21 }
 0x1ad   :  { %v4470_v10 = vpop.xlane.xlu1 %1407  ;;  %1596 = vrot.lane.b32.xlu1 %v4396_v0, %s3815_s21  ;;  %v4474_v29 = vpop.xlane.xlu0 %1398 }
 0x1ae   :  { %5813 = vst [vmem:[#allocation35_spill] sm:$0xff] %v4470_v10  ;;  %5814 = vst [vmem:[#allocation36_spill] sm:$0xff] %v4474_v29  ;;  %1590 = vrot.lane.b32.xlu0 %v4402_v38, %s3815_s21 }
 0x1b1   :  { %v4478_v45 = vpop.xlane.xlu1 %1413  ;;  %1608 = vrot.lane.b32.xlu1 %v4390_v5, %s3816_s22  ;;  %v4482_v53 = vpop.xlane.xlu0 %1404 }
 0x1b2   :  { %5815 = vst [vmem:[#allocation37_spill] sm:$0xff] %v4478_v45  ;;  %5816 = vst [vmem:[#allocation38_spill] sm:$0xff] %v4482_v53  ;;  %1594 = vrot.lane.b32.xlu0 %v4412_v22, %s3815_s21 }
 0x1b5   :  { %v4486_v14 = vpop.xlane.xlu1 %1419  ;;  %1612 = vrot.lane.b32.xlu1 %v4378_v6, %s3816_s22  ;;  %v4490_v17 = vpop.xlane.xlu0 %1410 }
 0x1b6   :  { %5817 = vst [vmem:[#allocation39_spill] sm:$0xff] %v4486_v14  ;;  %5818 = vst [vmem:[#allocation40_spill] sm:$0xff] %v4490_v17  ;;  %1606 = vrot.lane.b32.xlu0 %v4368_v49, %s3816_s22 }
 0x1b9   :  { %v4494_v37 = vpop.xlane.xlu1 %1425  ;;  %1616 = vrot.lane.b32.xlu1 %v4386_v9, %s3816_s22  ;;  %v4498_v34 = vpop.xlane.xlu0 %1416 }
 0x1ba   :  { %5819 = vst [vmem:[#allocation41_spill] sm:$0xff] %v4494_v37  ;;  %5820 = vst [vmem:[#allocation42_spill] sm:$0xff] %v4498_v34  ;;  %1610 = vrot.lane.b32.xlu0 %v4372_v63, %s3816_s22 }
 0x1bd   :  { %v4502_v8 = vpop.xlane.xlu1 %1431  ;;  %1620 = vrot.lane.b32.xlu1 %v4396_v0, %s3816_s22  ;;  %v4506_v11 = vpop.xlane.xlu0 %1422 }
 0x1be   :  { %5821 = vst [vmem:[#allocation43_spill] sm:$0xff] %v4502_v8  ;;  %5822 = vst [vmem:[#allocation44_spill] sm:$0xff] %v4506_v11  ;;  %1614 = vrot.lane.b32.xlu0 %v4402_v38, %s3816_s22 }
 0x1c1   :  { %v4510_v26 = vpop.xlane.xlu1 %1437  ;;  %1632 = vrot.lane.b32.xlu1 %v4390_v5, %s3817_s23  ;;  %v4514_v42 = vpop.xlane.xlu0 %1428 }
 0x1c2   :  { %5823 = vst [vmem:[#allocation45_spill] sm:$0xff] %v4510_v26  ;;  %5824 = vst [vmem:[#allocation46_spill] sm:$0xff] %v4514_v42  ;;  %1618 = vrot.lane.b32.xlu0 %v4412_v22, %s3816_s22 }
 0x1c5   :  { %v4518_v50 = vpop.xlane.xlu1 %1443  ;;  %1636 = vrot.lane.b32.xlu1 %v4378_v6, %s3817_s23  ;;  %v4522_v2 = vpop.xlane.xlu0 %1434 }
 0x1c6   :  { %5825 = vst [vmem:[#allocation47_spill] sm:$0xff] %v4518_v50  ;;  %5826 = vst [vmem:[#allocation48_spill] sm:$0xff] %v4522_v2  ;;  %1630 = vrot.lane.b32.xlu0 %v4368_v49, %s3817_s23 }
 0x1c9   :  { %v4526_v3 = vpop.xlane.xlu1 %1449  ;;  %1640 = vrot.lane.b32.xlu1 %v4386_v9, %s3817_s23  ;;  %v4530_v35 = vpop.xlane.xlu0 %1440 }
 0x1ca   :  { %5827 = vst [vmem:[#allocation49_spill] sm:$0xff] %v4526_v3  ;;  %5828 = vst [vmem:[#allocation50_spill] sm:$0xff] %v4530_v35  ;;  %1634 = vrot.lane.b32.xlu0 %v4372_v63, %s3817_s23 }
 0x1cd   :  { %v4534_v52 = vpop.xlane.xlu1 %1455  ;;  %1644 = vrot.lane.b32.xlu1 %v4396_v0, %s3817_s23  ;;  %v4538_v33 = vpop.xlane.xlu0 %1446 }
 0x1ce   :  { %5829 = vst [vmem:[#allocation51_spill] sm:$0xff] %v4534_v52  ;;  %5830 = vst [vmem:[#allocation52_spill] sm:$0xff] %v4538_v33  ;;  %1638 = vrot.lane.b32.xlu0 %v4402_v38, %s3817_s23 }
 0x1d1   :  { %v4542_v47 = vpop.xlane.xlu1 %1461  ;;  %1656 = vrot.lane.b32.xlu1 %v4390_v5, %s3818_s24  ;;  %v4546_v1 = vpop.xlane.xlu0 %1452 }
 0x1d2   :  { %5831 = vst [vmem:[#allocation53_spill] sm:$0xff] %v4542_v47  ;;  %5832 = vst [vmem:[#allocation54_spill] sm:$0xff] %v4546_v1  ;;  %1642 = vrot.lane.b32.xlu0 %v4412_v22, %s3817_s23 }
 0x1d5   :  { %v4550_v31 = vpop.xlane.xlu1 %1467  ;;  %1660 = vrot.lane.b32.xlu1 %v4378_v6, %s3818_s24  ;;  %v4554_v15 = vpop.xlane.xlu0 %1458 }
 0x1d6   :  { %5833 = vst [vmem:[#allocation55_spill] sm:$0xff] %v4550_v31  ;;  %5834 = vst [vmem:[#allocation56_spill] sm:$0xff] %v4554_v15  ;;  %1654 = vrot.lane.b32.xlu0 %v4368_v49, %s3818_s24 }
 0x1d9   :  { %v4558_v55 = vpop.xlane.xlu1 %1473  ;;  %1664 = vrot.lane.b32.xlu1 %v4386_v9, %s3818_s24  ;;  %v4562_v56 = vpop.xlane.xlu0 %1464 }
 0x1da   :  { %5835 = vst [vmem:[#allocation57_spill] sm:$0xff] %v4558_v55  ;;  %5836 = vst [vmem:[#allocation58_spill] sm:$0xff] %v4562_v56  ;;  %1658 = vrot.lane.b32.xlu0 %v4372_v63, %s3818_s24 }
 0x1dd   :  { %v4566_v32 = vpop.xlane.xlu1 %1479  ;;  %1668 = vrot.lane.b32.xlu1 %v4396_v0, %s3818_s24  ;;  %v4570_v27 = vpop.xlane.xlu0 %1470 }
 0x1de   :  { %5837 = vst [vmem:[#allocation59_spill] sm:$0xff] %v4566_v32  ;;  %5838 = vst [vmem:[#allocation60_spill] sm:$0xff] %v4570_v27  ;;  %1662 = vrot.lane.b32.xlu0 %v4402_v38, %s3818_s24 }
 0x1e1   :  { %v4574_v40 = vpop.xlane.xlu1 %1485  ;;  %1680 = vrot.lane.b32.xlu1 %v4390_v5, %s3819_s25  ;;  %v4578_v23 = vpop.xlane.xlu0 %1476 }
 0x1e2   :  { %5839 = vst [vmem:[#allocation61_spill] sm:$0xff] %v4574_v40  ;;  %5840 = vst [vmem:[#allocation62_spill] sm:$0xff] %v4578_v23  ;;  %1666 = vrot.lane.b32.xlu0 %v4412_v22, %s3818_s24 }
 0x1e5   :  { %v4582_v62 = vpop.xlane.xlu1 %1491  ;;  %1684 = vrot.lane.b32.xlu1 %v4378_v6, %s3819_s25  ;;  %v4586_v39 = vpop.xlane.xlu0 %1482 }
 0x1e6   :  { %5841 = vst [vmem:[#allocation63_spill] sm:$0xff] %v4582_v62  ;;  %5842 = vst [vmem:[#allocation64_spill] sm:$0xff] %v4586_v39  ;;  %1678 = vrot.lane.b32.xlu0 %v4368_v49, %s3819_s25 }
 0x1e9   :  { %v4590_v54 = vpop.xlane.xlu1 %1497  ;;  %1688 = vrot.lane.b32.xlu1 %v4386_v9, %s3819_s25  ;;  %v4594_v46 = vpop.xlane.xlu0 %1488 }
 0x1ea   :  { %5843 = vst [vmem:[#allocation65_spill] sm:$0xff] %v4590_v54  ;;  %5844 = vst [vmem:[#allocation66_spill] sm:$0xff] %v4594_v46  ;;  %1682 = vrot.lane.b32.xlu0 %v4372_v63, %s3819_s25 }
 0x1ed   :  { %v4598_v23 = vpop.xlane.xlu1 %1503  ;;  %1692 = vrot.lane.b32.xlu1 %v4396_v0, %s3819_s25  ;;  %v4602_v42 = vpop.xlane.xlu0 %1494 }
 0x1ee   :  { %5845 = vst [vmem:[#allocation67_spill] sm:$0xff] %v4598_v23  ;;  %5846 = vst [vmem:[#allocation68_spill] sm:$0xff] %v4602_v42  ;;  %1686 = vrot.lane.b32.xlu0 %v4402_v38, %s3819_s25 }
 0x1f1   :  { %v4606_v1 = vpop.xlane.xlu1 %1509  ;;  %v4608_v58 = vpop.xlane.xlu0 %1500 }
 0x1f2   :  { %5847 = vst [vmem:[#allocation69_spill] sm:$0xff] %v4606_v1  ;;  %5848 = vst [vmem:[#allocation70_spill] sm:$0xff] %v4608_v58  ;;  %1690 = vrot.lane.b32.xlu0 %v4412_v22, %s3819_s25 }
 0x1f5   :  { %v4612_v53 = vpop.xlane.xlu1 %1515  ;;  %v4614_v55 = vpop.xlane.xlu0 %1506 }
 0x1f6   :  { %5849 = vst [vmem:[#allocation71_spill] sm:$0xff] %v4612_v53  ;;  %5850 = vst [vmem:[#allocation72_spill] sm:$0xff] %v4614_v55 }
 0x1f9   :  { %v4616_v54 = vpop.xlane.xlu1 %1521  ;;  %v4618_v48 = vpop.xlane.xlu0 %1512 }
 0x1fa   :  { %5851 = vst [vmem:[#allocation73_spill] sm:$0xff] %v4616_v54  ;;  %5852 = vst [vmem:[#allocation74_spill] sm:$0xff] %v4618_v48 }
 0x1fd   :  { %v4620_v37 = vpop.permute.xlu1 %1534  ;;  %v4622_v4 = vpop.xlane.xlu0 %1518 }
 0x1fe   :  { %5853 = vst [vmem:[#allocation75_spill] sm:$0xff] %v4620_v37  ;;  %5854 = vst [vmem:[#allocation76_spill] sm:$0xff] %v4622_v4 }
 0x201   :  { %v4624_v3 = vpop.permute.xlu1 %1538  ;;  %v4626_v43 = vpop.xlane.xlu0 %1524 }
 0x202   :  { %5855 = vst [vmem:[#allocation77_spill] sm:$0xff] %v4624_v3  ;;  %5856 = vst [vmem:[#allocation78_spill] sm:$0xff] %v4626_v43 }
 0x205   :  { %v4628_v58 = vpop.permute.xlu1 %1540  ;;  %v4630_v13 = vpop.permute.xlu0 %1536 }
 0x206   :  { %5857 = vst [vmem:[#allocation79_spill] sm:$0xff] %v4628_v58  ;;  %5858 = vst [vmem:[#allocation80_spill] sm:$0xff] %v4630_v13 }
 0x209   :  { %v4632_v27 = vpop.permute.xlu1 %1544  ;;  %v4634_v42 = vpop.permute.xlu0 %1542 }
 0x20a   :  { %5859 = vst [vmem:[#allocation81_spill] sm:$0xff] %v4632_v27  ;;  %5860 = vst [vmem:[#allocation82_spill] sm:$0xff] %v4634_v42 }
 0x20d   :  { %v4636_v11 = vpop.permute.xlu1 %1548  ;;  %v4638_v54 = vpop.permute.xlu0 %1546 }
 0x211   :  { %v4640_v28 = vpop.permute.xlu1 %1560  ;;  %v4642_v33 = vpop.permute.xlu0 %1558 }
 0x212   :  { %5861 = vst [vmem:[#allocation83_spill] sm:$0xff] %v4640_v28  ;;  %5862 = vst [vmem:[#allocation84_spill] sm:$0xff] %v4642_v33  ;;  %v1702_v17 = vcombine.low %v4368_v49, %v4642_v33  ;;  %v1838_v10 = vcombine.low %v4390_v5, %v4640_v28 }
 0x214   :  { %v4731_v41 = vrot.slane %v1702_v17, %v4068_v21 }
 0x215   :  { %v4644_v4 = vpop.permute.xlu1 %1564  ;;  %v4646_v29 = vpop.permute.xlu0 %1562 }
 0x216   :  { %5863 = vst [vmem:[#allocation85_spill] sm:$0xff] %v4644_v4  ;;  %5864 = vst [vmem:[#allocation86_spill] sm:$0xff] %v4646_v29 }
 0x219   :  { %v4648_v43 = vpop.permute.xlu1 %1568  ;;  %v4650_v53 = vpop.permute.xlu0 %1566 }
 0x21a   :  { %5865 = vst [vmem:[#allocation87_spill] sm:$0xff] %v4648_v43  ;;  %5866 = vst [vmem:[#allocation88_spill] sm:$0xff] %v4650_v53  ;;  %v2246_v17 = vcombine.low %v4402_v38, %v4650_v53 }
 0x21d   :  { %v4652_v60 = vpop.permute.xlu1 %1572  ;;  %v4654_v31 = vpop.permute.xlu0 %1570 }
 0x221   :  { %v4656_v14 = vpop.permute.xlu1 %1584  ;;  %v4658_v62 = vpop.permute.xlu0 %1582 }
 0x222   :  { %5867 = vst [vmem:[#allocation89_spill] sm:$0xff] %v4656_v14  ;;  %v1718_v15 = vcombine.low %v4620_v37, %v4658_v62  ;;  %v1854_v2 = vcombine.low %v4630_v13, %v4656_v14  ;;  %v2110_v13 = vcombine.low %v4378_v6, %v4644_v4 }
 0x224   :  { %v4719_v24 = vrot.slane %v1718_v15, %v4068_v21  ;;  %v4722_v61 = vrot.slane %v1854_v2, %v4068_v21  ;;  %v4740_v2 = vrot.slane %v1838_v10, %v4068_v21 }
 0x225   :  { %v4660_v50 = vpop.permute.xlu1 %1588  ;;  %v4662_v25 = vpop.permute.xlu0 %1586 }
 0x226   :  { %5868 = vst [vmem:[#allocation90_spill] sm:$0xff] %v4660_v50  ;;  %5869 = vst [vmem:[#allocation91_spill] sm:$0xff] %v4662_v25  ;;  %v2126_v36 = vcombine.low %v4628_v58, %v4660_v50  ;;  %v1990_v59 = vcombine.low %v4624_v3, %v4662_v25  ;;  %v1974_v58 = vcombine.low %v4372_v63, %v4646_v29 }
 0x227   :  { %v2382_v50 = vcombine.low %v4386_v9, %v4648_v43  ;;  %v1766_v3 = vcombine.low %v4731_v41, %v4719_v24  ;;  %v1902_v15 = vcombine.low %v4740_v2, %v4722_v61  ;;  %v4761_v63 = vrot.slane %v2110_v13, %v4068_v21 }
 0x228   :  { %v4753_v25 = vrot.slane %v2126_v36, %v4068_v21  ;;  %v4756_v10 = vrot.slane %v1990_v59, %v4068_v21  ;;  %v4772_v36 = vrot.slane %v1974_v58, %v4068_v21 }
 0x229   :  { %v4664_v18 = vpop.permute.xlu1 %1592  ;;  %v4666_v48 = vpop.permute.xlu0 %1590  ;;  %v4775_v59 = vrot.slane %v2382_v50, %v4068_v21  ;;  %v4787_v4 = vrot.slane %v1766_v3, %v4081_v7 }
 0x22a   :  { %5870 = vst [vmem:[#allocation92_spill] sm:$0xff] %v4664_v18  ;;  %5871 = vst [vmem:[#allocation93_spill] sm:$0xff] %v4666_v48  ;;  %v2398_v38 = vcombine.low %v4632_v27, %v4664_v18  ;;  %v4781_v27 = vrot.slane %v2246_v17, %v4068_v21  ;;  %v2262_v29 = vcombine.low %v4634_v42, %v4666_v48 }
 0x22b   :  { %v4796_v17 = vrot.slane %v1902_v15, %v4081_v7 }
 0x22c   :  { %v4799_v18 = vrot.slane %v2398_v38, %v4068_v21 }
 0x22d   :  { %v4668_v19 = vpop.permute.xlu1 %1596  ;;  %v4670_v46 = vpop.permute.xlu0 %1594 }
 0x231   :  { %v4672_v56 = vpop.permute.xlu1 %1608  ;;  %v4674_v34 = vpop.permute.xlu0 %1606 }
 0x235   :  { %v4676_v35 = vpop.permute.xlu1 %1612  ;;  %v4678_v16 = vpop.permute.xlu0 %1610 }
 0x239   :  { %v4680_v51 = vpop.permute.xlu1 %1616  ;;  %v4682_v1 = vpop.permute.xlu0 %1614 }
 0x23d   :  { %v4684_v57 = vpop.permute.xlu1 %1620  ;;  %v4686_v47 = vpop.permute.xlu0 %1618 }
 0x241   :  { %v4688_v40 = vpop.permute.xlu1 %1632  ;;  %v4690_v45 = vpop.permute.xlu0 %1630 }
 0x245   :  { %v4692_v26 = vpop.permute.xlu1 %1636  ;;  %v4694_v12 = vpop.permute.xlu0 %1634 }
 0x249   :  { %v4696_v44 = vpop.permute.xlu1 %1640  ;;  %v4698_v55 = vpop.permute.xlu0 %1638 }
 0x24d   :  { %v4700_v20 = vpop.permute.xlu1 %1644  ;;  %v4702_v39 = vpop.permute.xlu0 %1642 }
 0x251   :  { %v4704_v23 = vpop.permute.xlu1 %1656  ;;  %v1655_v32 = vpop.permute.xlu0 %1654 }
 0x252   :  { %v1871_v53 = vcombine.high %v4672_v56, %v4704_v23  ;;  %v1734_v13 = vcombine.low %v4674_v34, %v1655_v32  ;;  %v1735_v9 = vcombine.high %v4674_v34, %v1655_v32  ;;  %v1870_v34 = vcombine.low %v4672_v56, %v4704_v23 }
 0x254   :  { %v4804_v3 = vrot.slane %v1871_v53, %v4068_v21  ;;  %v4808_v50 = vrot.slane %v1734_v13, %v4068_v21  ;;  %v4814_v38 = vrot.slane %v1735_v9, %v4068_v21 }
 0x255   :  { %v4710_v52 = vpop.permute.xlu1 %1660  ;;  %v4714_v8 = vpop.permute.xlu0 %1658 }
 0x256   :  { %5872 = vst [vmem:[#allocation94_spill] sm:$0xff] %v4804_v3  ;;  %5873 = vst [vmem:[#allocation95_spill] sm:$0xff] %v4814_v38  ;;  %v2142_v56 = vcombine.low %v4676_v35, %v4710_v52  ;;  %v2143_v53 = vcombine.high %v4676_v35, %v4710_v52  ;;  %v2006_v13 = vcombine.low %v4678_v16, %v4714_v8 }
 0x257   :  { %v4837_v35 = vrot.slane %v1870_v34, %v4068_v21 }
 0x258   :  { %v4856_v52 = vrot.slane %v2143_v53, %v4068_v21 }
 0x259   :  { %v4728_v30 = vpop.permute.xlu1 %1664  ;;  %v4737_v14 = vpop.permute.xlu0 %1662 }
 0x25a   :  { %5876 = vst [vmem:[#allocation98_spill] sm:$0xff] %v4856_v52  ;;  %v2279_v53 = vcombine.high %v4682_v1, %v4737_v14 }
 0x25d   :  { %v4758_v6 = vpop.permute.xlu1 %1668  ;;  %v4769_v43 = vpop.permute.xlu0 %1666 }
 0x261   :  { %v1681_v5 = vpop.permute.xlu1 %1680  ;;  %v1679_v58 = vpop.permute.xlu0 %1678 }
 0x262   :  { %v1887_v32 = vcombine.high %v4688_v40, %v1681_v5  ;;  %v1886_v42 = vcombine.low %v4688_v40, %v1681_v5  ;;  %v1750_v15 = vcombine.low %v4690_v45, %v1679_v58  ;;  %v1751_v48 = vcombine.high %v4690_v45, %v1679_v58 }
 0x263   :  { %v2007_v5 = vcombine.high %v4678_v16, %v4714_v8  ;;  %v4834_v58 = vrot.slane %v2262_v29, %v4068_v21  ;;  %v2414_v29 = vcombine.low %v4680_v51, %v4728_v30 }
 0x264   :  { %v4821_v23 = vrot.slane %v1887_v32, %v4068_v21  ;;  %v4828_v45 = vrot.slane %v1750_v15, %v4068_v21  ;;  %v4831_v9 = vrot.slane %v1751_v48, %v4068_v21  ;;  %v4844_v8 = vrot.slane %v1886_v42, %v4068_v21 }
 0x265   :  { %v1685_v40 = vpop.permute.xlu1 %1684  ;;  %v1683_v16 = vpop.permute.xlu0 %1682  ;;  %v4853_v15 = vrot.slane %v2142_v56, %v4068_v21  ;;  %v4864_v3 = vrot.slane %v2007_v5, %v4068_v21 }
 0x266   :  { %5874 = vst [vmem:[#allocation96_spill] sm:$0xff] %v4821_v23  ;;  %5875 = vst [vmem:[#allocation97_spill] sm:$0xff] %v4831_v9  ;;  %v1798_v48 = vcombine.low %v4808_v50, %v4828_v45  ;;  %v2159_v32 = vcombine.high %v4692_v26, %v1685_v40  ;;  %v2023_v42 = vcombine.high %v4694_v12, %v1683_v16 }
 0x267   :  { %v4861_v23 = vrot.slane %v2006_v13, %v4068_v21  ;;  %v2022_v34 = vcombine.low %v4694_v12, %v1683_v16  ;;  %v2158_v9 = vcombine.low %v4692_v26, %v1685_v40  ;;  %v1934_v5 = vcombine.low %v4837_v35, %v4844_v8 }
 0x268   :  { %v4873_v38 = vrot.slane %v2159_v32, %v4068_v21  ;;  %v4876_v13 = vrot.slane %v2023_v42, %v4068_v21  ;;  %v1806_v16 = vrot.slane %v1798_v48, %v4081_v7  ;;  %v5878_v26 = vcombine.high %v4680_v51, %v4728_v30 }
 0x269   :  { %v1689_v56 = vpop.permute.xlu1 %1688  ;;  %v1687_v28 = vpop.permute.xlu0 %1686  ;;  %v2278_v32 = vcombine.low %v4682_v1, %v4737_v14  ;;  %v4896_v37 = vrot.slane %v2022_v34, %v4068_v21  ;;  %v4906_v14 = vrot.slane %v2279_v53, %v4068_v21  ;;  %v4909_v1 = vrot.slane %v2158_v9, %v4068_v21 }
 0x26a   :  { %5877 = vst [vmem:[#allocation99_spill] sm:$0xff] %v4873_v38  ;;  %v2431_v49 = vcombine.high %v4696_v44, %v1689_v56  ;;  %v2295_v12 = vcombine.high %v4698_v55, %v1687_v28  ;;  %v4887_v40 = vrot.slane %v5878_v26, %v4068_v21  ;;  %v2294_v51 = vcombine.low %v4698_v55, %v1687_v28 }
 0x26b   :  { %5880 = vst [vmem:[#allocation101_spill] sm:$0xff] %v4906_v14  ;;  %v1831_v30 = vcombine.high %v4787_v4, %v1806_v16  ;;  %v1830_v28 = vcombine.low %v4787_v4, %v1806_v16  ;;  %v1942_v55 = vrot.slane %v1934_v5, %v4081_v7  ;;  %v5883_v9 = vcombine.high %v4684_v57, %v4758_v6 }
 0x26c   :  { %5879 = vst [vmem:[#allocation100_spill] sm:$0xff] %v4887_v40  ;;  %v4912_v33 = vrot.slane %v2431_v49, %v4068_v21  ;;  %v4915_v34 = vrot.slane %v2295_v12, %v4068_v21  ;;  %v2430_v49 = vcombine.low %v4696_v44, %v1689_v56  ;;  %v2070_v4 = vcombine.low %v4861_v23, %v4896_v37 }
 0x26d   :  { %v4903_v26 = vpop.permute.xlu1 %1692  ;;  %v4926_v53 = vrot.slane %v5883_v9, %v4068_v21  ;;  %v1691_v38 = vpop.permute.xlu0 %1690  ;;  %v4936_v5 = vrot.slane %v2294_v51, %v4068_v21  ;;  %v2206_v44 = vcombine.low %v4853_v15, %v4909_v1  ;;  %v2793_v48 = vsel %vm1333_vm0, %v1831_v30, 0.0 }
 0x26e   :  { %5881 = vst [vmem:[#allocation102_spill] sm:$0xff] %v4912_v33  ;;  %5882 = vst [vmem:[#allocation103_spill] sm:$0xff] %v4915_v34  ;;  %v2703_v42 = vcombine.high %v4700_v20, %v4903_v26  ;;  %v2790_v12 = vsel %vm1333_vm0, %v1830_v28, 0.0  ;;  %v4950_v33 = vrot.slane %v2278_v32, %v4068_v21  ;;  %2794 = vadd.xlane.f32.xlu1 %v2793_v48 }
 0x26f   :  { %5884 = vst [vmem:[#allocation104_spill] sm:$0xff] %v4926_v53  ;;  %2791 = vadd.xlane.f32.xlu0 %v2790_v12  ;;  %v2567_v51 = vcombine.high %v4702_v39, %v1691_v38  ;;  %v1966_v16 = vcombine.low %v4796_v17, %v1942_v55  ;;  %v5886_v9 = vcombine.high %v4686_v47, %v4769_v43 }
 0x270   :  { %v4945_v56 = vrot.slane %v2703_v42, %v4068_v21  ;;  %v4961_v42 = vrot.slane %v2430_v49, %v4068_v21  ;;  %v2342_v48 = vcombine.low %v4950_v33, %v4936_v5  ;;  %v2566_v28 = vcombine.low %v4702_v39, %v1691_v38 }
 0x271   :  { %v4958_v40 = vrot.slane %v5886_v9, %v4068_v21  ;;  %v4971_v12 = vrot.slane %v2567_v51, %v4068_v21  ;;  %v2078_v9 = vrot.slane %v2070_v4, %v4081_v7  ;;  %v2814_v52 = vsel %vm1333_vm0, %v1966_v16, 0.0 }
 0x272   :  { %5885 = vst [vmem:[#allocation105_spill] sm:$0xff] %v4945_v56  ;;  %v5889_v49 = vcombine.low %v4772_v36, %v4756_v10  ;;  %v1967_v34 = vcombine.high %v4796_v17, %v1942_v55  ;;  %v2214_v32 = vrot.slane %v2206_v44, %v4081_v7  ;;  %v4982_v56 = vrot.slane %v2414_v29, %v4068_v21 }
 0x273   :  { %5887 = vst [vmem:[#allocation106_spill] sm:$0xff] %v4958_v40  ;;  %5888 = vst [vmem:[#allocation107_spill] sm:$0xff] %v4971_v12  ;;  %v2550_v39 = vcombine.low %v4686_v47, %v4769_v43  ;;  %2815 = vadd.xlane.f32.xlu0 %v2814_v52  ;;  %v2310_v16 = vcombine.low %v4781_v27, %v4834_v58  ;;  %v2534_v17 = vcombine.low %v4638_v54, %v4670_v46 }
 0x274   :  { %v2046_v30 = vrot.slane %v5889_v49, %v4081_v7  ;;  %v5890_v29 = vcombine.low %v4761_v63, %v4753_v25  ;;  %v2478_v43 = vcombine.low %v4982_v56, %v4961_v42  ;;  %v2702_v47 = vcombine.low %v4700_v20, %v4903_v26 }
 0x275   :  { %v5003_v52 = vrot.slane %v2566_v28, %v4068_v21  ;;  %v2350_v51 = vrot.slane %v2342_v48, %v4081_v7  ;;  %v2817_v4 = vsel %vm1333_vm0, %v1967_v34, 0.0  ;;  %v2686_v12 = vcombine.low %v4684_v57, %v4758_v6 }
 0x276   :  { %v2102_v55 = vcombine.low %v2046_v30, %v2078_v9  ;;  %v2182_v44 = vrot.slane %v5890_v29, %v4081_v7  ;;  %v2103_v53 = vcombine.high %v2046_v30, %v2078_v9  ;;  %v2446_v29 = vcombine.low %v4775_v59, %v4799_v18 }
 0x277   :  { %v5013_v40 = vrot.slane %v2550_v39, %v4068_v21  ;;  %2818 = vadd.xlane.f32.xlu0 %v2817_v4  ;;  %v2654_v20 = vcombine.low %v4396_v0, %v4652_v60  ;;  %v2670_v26 = vcombine.low %v4636_v11, %v4668_v19  ;;  %v5020_v34 = vrot.slane %v2534_v17, %v4068_v21 }
 0x278   :  { %v2838_v49 = vsel %vm1333_vm0, %v2102_v55, 0.0  ;;  %v2238_v38 = vcombine.low %v2182_v44, %v2214_v32  ;;  %v2318_v30 = vrot.slane %v2310_v16, %v4081_v7  ;;  %v5891_v6 = vcombine.low %v4412_v22, %v4654_v31 }
 0x279   :  { %2839 = vadd.xlane.f32.xlu1 %v2838_v49  ;;  %v5030_v48 = vrot.slane %v2702_v47, %v4068_v21  ;;  %v2614_v28 = vcombine.low %v5013_v40, %v5003_v52  ;;  %v2486_v9 = vrot.slane %v2478_v43, %v4081_v7  ;;  %v2841_v4 = vsel %vm1333_vm0, %v2103_v53, 0.0 }
 0x27a   :  { %v5027_v57 = vrot.slane %v5891_v6, %v4068_v21  ;;  %v2862_v39 = vsel %vm1333_vm0, %v2238_v38, 0.0  ;;  %v2374_v17 = vcombine.low %v2318_v30, %v2350_v51  ;;  %v2239_v16 = vcombine.high %v2182_v44, %v2214_v32 }
 0x27b   :  { %v5038_v55 = vrot.slane %v2686_v12, %v4068_v21  ;;  %2842 = vadd.xlane.f32.xlu0 %v2841_v4  ;;  %v2454_v49 = vrot.slane %v2446_v29, %v4081_v7  ;;  %v5042_v47 = vrot.slane %v2670_v26, %v4068_v21  ;;  %v5047_v43 = vrot.slane %v2654_v20, %v4068_v21 }
 0x27c   :  { %v2582_v6 = vcombine.low %v5027_v57, %v5020_v34  ;;  %v2886_v12 = vsel %vm1333_vm0, %v2374_v17, 0.0  ;;  %v2865_v38 = vsel %vm1333_vm0, %v2239_v16, 0.0  ;;  %v2375_v44 = vcombine.high %v2318_v30, %v2350_v51 }
 0x27d   :  { %2863 = vadd.xlane.f32.xlu1 %v2862_v39  ;;  %v2750_v53 = vcombine.low %v5038_v55, %v5030_v48  ;;  %v2510_v32 = vcombine.low %v2454_v49, %v2486_v9  ;;  %v2622_v29 = vrot.slane %v2614_v28, %v4081_v7  ;;  %v2718_v26 = vcombine.low %v5047_v43, %v5042_v47 }
 0x27e   :  { %v2590_v39 = vrot.slane %v2582_v6, %v4081_v7  ;;  %v1799_v20 = vcombine.high %v4808_v50, %v4828_v45  ;;  %v2889_v14 = vsel %vm1333_vm0, %v2375_v44, 0.0  ;;  %v2511_v0 = vcombine.high %v2454_v49, %v2486_v9 }
 0x27f   :  { %2866 = vadd.xlane.f32.xlu0 %v2865_v38  ;;  %v2910_v4 = vsel %vm1333_vm0, %v2510_v32, 0.0  ;;  %v2758_v51 = vrot.slane %v2750_v53, %v4081_v7  ;;  %v1767_v30 = vcombine.high %v4731_v41, %v4719_v24  ;;  %v2726_v28 = vrot.slane %v2718_v26, %v4081_v7 }
 0x280   :  { %v2646_v17 = vcombine.low %v2590_v39, %v2622_v29  ;;  %v1935_v16 = vcombine.high %v4837_v35, %v4844_v8  ;;  %v2071_v50 = vcombine.high %v4861_v23, %v4896_v37  ;;  %v5070_v45 = vrot.slane %v1799_v20, %v4081_v7 }
 0x281   :  { %2887 = vadd.xlane.f32.xlu1 %v2886_v12  ;;  %v2913_v49 = vsel %vm1333_vm0, %v2511_v0, 0.0  ;;  %v2782_v6 = vcombine.low %v2726_v28, %v2758_v51  ;;  %v2647_v53 = vcombine.high %v2590_v39, %v2622_v29  ;;  %v1903_v41 = vcombine.high %v4740_v2, %v4722_v61 }
 0x282   :  { %v2934_v9 = vsel %vm1333_vm0, %v2646_v17, 0.0  ;;  %v1781_v24 = vrot.slane %v1767_v30, %v4081_v7  ;;  %v2039_v35 = vcombine.high %v4772_v36, %v4756_v10  ;;  %v2207_v37 = vcombine.high %v4853_v15, %v4909_v1 }
 0x283   :  { %2890 = vadd.xlane.f32.xlu0 %v2889_v14  ;;  %v2343_v23 = vcombine.high %v4950_v33, %v4936_v5  ;;  %v5085_v8 = vrot.slane %v1935_v16, %v4081_v7  ;;  %v2958_v61 = vsel %vm1333_vm0, %v2782_v6, 0.0  ;;  %v2937_v2 = vsel %vm1333_vm0, %v2647_v53, 0.0  ;;  %v5893_v6 = vld [vmem:[#allocation84_spill] sm:$0xff]  ;;  %v5894_v53 = vld [vmem:[#allocation18_spill] sm:$0xff] }
 0x284   :  { %v1832_v0 = vcombine.low %v1781_v24, %v5070_v45  ;;  %v2783_v14 = vcombine.high %v2726_v28, %v2758_v51  ;;  %v5090_v32 = vrot.slane %v2071_v50, %v4081_v7  ;;  %v2311_v10 = vcombine.high %v4781_v27, %v4834_v58 }
 0x285   :  { %2911 = vadd.xlane.f32.xlu1 %v2910_v4  ;;  %v1917_v33 = vrot.slane %v1903_v41, %v4081_v7  ;;  %v2175_v36 = vcombine.high %v4761_v63, %v4753_v25  ;;  %v2053_v15 = vrot.slane %v2039_v35, %v4081_v7  ;;  %v2479_v1 = vcombine.high %v4982_v56, %v4961_v42 }
 0x286   :  { %v2615_v5 = vcombine.high %v5013_v40, %v5003_v52  ;;  %v5104_v38 = vrot.slane %v2343_v23, %v4081_v7  ;;  %v2796_v27 = vsel %vm1333_vm0, %v1832_v0, 0.0  ;;  %v2961_v58 = vsel %vm1333_vm0, %v2783_v14, 0.0  ;;  %v5898_v14 = vld [vmem:[#allocation12_spill] sm:$0xff] }
 0x287   :  { %2914 = vadd.xlane.f32.xlu0 %v2913_v49  ;;  %v1968_v12 = vcombine.low %v1917_v33, %v5085_v8  ;;  %v2104_v44 = vcombine.low %v2053_v15, %v5090_v32  ;;  %v5110_v63 = vrot.slane %v2207_v37, %v4081_v7  ;;  %v5113_v25 = vrot.slane %v2311_v10, %v4081_v7 }
 0x288   :  { %v2447_v40 = vcombine.high %v4775_v59, %v4799_v18  ;;  %v2583_v56 = vcombine.high %v5027_v57, %v5020_v34  ;;  %v2189_v42 = vrot.slane %v2175_v36, %v4081_v7  ;;  %v2751_v52 = vcombine.high %v5038_v55, %v5030_v48  ;;  %v5900_v36 = vld [vmem:[#allocation80_spill] sm:$0xff] }
 0x289   :  { %2935 = vadd.xlane.f32.xlu1 %v2934_v9  ;;  %v2820_v29 = vsel %vm1333_vm0, %v1968_v12, 0.0  ;;  %v2376_v26 = vcombine.low %v5113_v25, %v5104_v38  ;;  %v2844_v39 = vsel %vm1333_vm0, %v2104_v44, 0.0  ;;  %v5128_v4 = vrot.slane %v2615_v5, %v4081_v7  ;;  %v5892_v9 = vld [vmem:[#allocation75_spill] sm:$0xff] }
 0x28a   :  { %v2240_v20 = vcombine.low %v2189_v42, %v5110_v63  ;;  %v5131_v18 = vrot.slane %v2479_v1, %v4081_v7  ;;  %v2719_v59 = vcombine.high %v5047_v43, %v5042_v47  ;;  %v5136_v34 = vrot.slane %v2583_v56, %v4081_v7  ;;  %v5901_v12 = vld [vmem:[#allocation91_spill] sm:$0xff] }
 0x28b   :  { %2938 = vadd.xlane.f32.xlu0 %v2937_v2  ;;  %v5139_v57 = vrot.slane %v2447_v40, %v4081_v7  ;;  %v2892_v48 = vsel %vm1333_vm0, %v2376_v26, 0.0  ;;  %v5148_v30 = vrot.slane %v2751_v52, %v4081_v7  ;;  %v1833_v16 = vcombine.high %v1781_v24, %v5070_v45  ;;  %v5895_v45 = vld [vmem:[#allocation83_spill] sm:$0xff]  ;;  %v5896_v24 = vld [vmem:[#allocation6_spill] sm:$0xff]  ;;  %v5897_v2 = vld [vmem:[#allocation85_spill] sm:$0xff] }
 0x28c   :  { %v2868_v55 = vsel %vm1333_vm0, %v2240_v20, 0.0  ;;  %v2648_v17 = vcombine.low %v5136_v34, %v5128_v4  ;;  %v5151_v47 = vrot.slane %v2719_v59, %v4081_v7  ;;  %v1719_v49 = vcombine.high %v5892_v9, %v4658_v62  ;;  %v5899_v62 = vld [vmem:[#allocation89_spill] sm:$0xff]  ;;  %v5906_v44 = vld [vmem:[#allocation15_spill] sm:$0xff]  ;;  %v5907_v59 = vld [vmem:[#allocation90_spill] sm:$0xff] }
 0x28d   :  { %2959 = vadd.xlane.f32.xlu1 %v2958_v61  ;;  %v2512_v51 = vcombine.low %v5139_v57, %v5131_v18  ;;  %v1703_v41 = vcombine.high %v5894_v53, %v5893_v6  ;;  %v2799_v35 = vsel %vm1333_vm0, %v1833_v16, 0.0  ;;  %v2105_v23 = vcombine.high %v2053_v15, %v5090_v32  ;;  %v5903_v32 = vld [vmem:[#allocation86_spill] sm:$0xff]  ;;  %v5904_v15 = vld [vmem:[#allocation13_spill] sm:$0xff]  ;;  %v5912_v9 = vld [vmem:[#allocation11_spill] sm:$0xff] }
 0x28e   :  { %v2940_v43 = vsel %vm1333_vm0, %v2648_v17, 0.0  ;;  %v2784_v50 = vcombine.low %v5151_v47, %v5148_v30  ;;  %v1969_v0 = vcombine.high %v1917_v33, %v5085_v8  ;;  %v1839_v61 = vcombine.high %v5896_v24, %v5895_v45  ;;  %v5905_v33 = vld [vmem:[#allocation87_spill] sm:$0xff]  ;;  %v5909_v17 = vld [vmem:[#allocation93_spill] sm:$0xff] }
 0x28f   :  { %2962 = vadd.xlane.f32.xlu0 %v2961_v58  ;;  %v2916_v28 = vsel %vm1333_vm0, %v2512_v51, 0.0  ;;  %v2111_v10 = vcombine.high %v5898_v14, %v5897_v2  ;;  %v1855_v1 = vcombine.high %v5900_v36, %v5899_v62  ;;  %v5173_v5 = vrot.slane %v1719_v49, %v4068_v21  ;;  %v5910_v51 = vld [vmem:[#allocation82_spill] sm:$0xff]  ;;  %v5917_v2 = vld [vmem:[#allocation81_spill] sm:$0xff] }
 0x290   :  { %v2964_v37 = vsel %vm1333_vm0, %v2784_v50, 0.0  ;;  %v1975_v8 = vcombine.high %v5904_v15, %v5903_v32  ;;  %v2383_v40 = vcombine.high %v5906_v44, %v5905_v33  ;;  %v2377_v56 = vcombine.high %v5113_v25, %v5104_v38  ;;  %v5911_v50 = vld [vmem:[#allocation88_spill] sm:$0xff]  ;;  %v5919_v32 = vld [vmem:[#allocation94_spill] sm:$0xff] }
 0x291   :  { %2797 = vadd.xlane.f32.xlu1 %v2796_v27  ;;  %v5902_v27 = vld [vmem:[#allocation77_spill] sm:$0xff]  ;;  %v5184_v52 = vrot.slane %v1703_v41, %v4068_v21  ;;  %v2823_v26 = vsel %vm1333_vm0, %v1969_v0, 0.0  ;;  %v5190_v20 = vrot.slane %v1839_v61, %v4068_v21  ;;  %v5197_v38 = vrot.slane %v2111_v10, %v4068_v21  ;;  %v5916_v61 = vld [vmem:[#allocation92_spill] sm:$0xff] }
 0x292   :  { %v1991_v58 = vcombine.high %v5902_v27, %v5901_v12  ;;  %v5200_v25 = vrot.slane %v1855_v1, %v4068_v21  ;;  %v5211_v16 = vrot.slane %v2383_v40, %v4068_v21  ;;  %v2247_v49 = vcombine.high %v5912_v9, %v5911_v50  ;;  %v5920_v15 = vld [vmem:[#allocation96_spill] sm:$0xff]  ;;  %v5927_v50 = vld [vmem:[#allocation99_spill] sm:$0xff] }
 0x293   :  { %2821 = vadd.xlane.f32.xlu0 %v2820_v29  ;;  %v2847_v29 = vsel %vm1333_vm0, %v2105_v23, 0.0  ;;  %v2895_v6 = vsel %vm1333_vm0, %v2377_v56, 0.0  ;;  %v2649_v41 = vcombine.high %v5136_v34, %v5128_v4  ;;  %v5914_v23 = vld [vmem:[#allocation97_spill] sm:$0xff]  ;;  %v2399_v14 = vcombine.high %v5917_v2, %v5916_v61  ;;  %v5929_v2 = vld [vmem:[#allocation106_spill] sm:$0xff] }
 0x294   :  { %v1918_v4 = vcombine.low %v5190_v20, %v5200_v25  ;;  %v2535_v34 = vcombine.high %v4638_v54, %v4670_v46  ;;  %v5243_v62 = vrot.slane %v2247_v49, %v4068_v21  ;;  %v2519_v36 = vcombine.high %v4412_v22, %v4654_v31 }
 0x295   :  { %2845 = vadd.xlane.f32.xlu1 %v2844_v39  ;;  %v2241_v39 = vcombine.high %v2189_v42, %v5110_v63  ;;  %v1782_v63 = vcombine.low %v5184_v52, %v5173_v5  ;;  %v5205_v42 = vrot.slane %v1991_v58, %v4068_v21  ;;  %v2785_v1 = vcombine.high %v5151_v47, %v5148_v30 }
 0x296   :  { %v5918_v12 = vcombine.low %v4864_v3, %v4876_v13  ;;  %v2943_v58 = vsel %vm1333_vm0, %v2649_v41, 0.0  ;;  %v5263_v31 = vrot.slane %v2399_v14, %v4068_v21  ;;  %v2671_v47 = vcombine.high %v4636_v11, %v4668_v19  ;;  %v5930_v14 = vld [vmem:[#allocation107_spill] sm:$0xff] }
 0x297   :  { %2869 = vadd.xlane.f32.xlu0 %v2868_v55  ;;  %v2871_v53 = vsel %vm1333_vm0, %v2241_v39, 0.0  ;;  %v5270_v44 = vrot.slane %v2535_v34, %v4068_v21  ;;  %v1926_v56 = vrot.slane %v1918_v4, %v4081_v7  ;;  %v5277_v39 = vrot.slane %v2519_v36, %v4068_v21 }
 0x298   :  { %v2094_v27 = vrot.slane %v5918_v12, %v4081_v7  ;;  %v5931_v4 = vcombine.low %v5929_v2, %v5930_v14  ;;  %v5932_v12 = vld [vmem:[#allocation100_spill] sm:$0xff] }
 0x299   :  { %2893 = vadd.xlane.f32.xlu1 %v2892_v48  ;;  %v5908_v48 = vld [vmem:[#allocation79_spill] sm:$0xff]  ;;  %v2598_v41 = vcombine.low %v5277_v39, %v5270_v44 }
 0x29a   :  { %v2127_v55 = vcombine.high %v5908_v48, %v5907_v59  ;;  %v2967_v59 = vsel %vm1333_vm0, %v2785_v1, 0.0  ;;  %v5923_v48 = vld [vmem:[#allocation101_spill] sm:$0xff] }
 0x29b   :  { %2917 = vadd.xlane.f32.xlu0 %v2916_v28  ;;  %v5208_v28 = vrot.slane %v1975_v8, %v4068_v21  ;;  %v5921_v8 = vcombine.low %v5919_v32, %v5920_v15 }
 0x29c   :  { %v5228_v24 = vrot.slane %v2127_v55, %v4068_v21  ;;  %v5924_v55 = vld [vmem:[#allocation103_spill] sm:$0xff] }
 0x29d   :  { %2941 = vadd.xlane.f32.xlu1 %v2940_v43  ;;  %v2263_v43 = vcombine.high %v5910_v51, %v5909_v17  ;;  %v1958_v33 = vrot.slane %v5921_v8, %v4081_v7  ;;  %v5925_v17 = vcombine.low %v5923_v48, %v5924_v55 }
 0x29e   :  { %v2190_v22 = vcombine.low %v5197_v38, %v5228_v24 }
 0x29f   :  { %2965 = vadd.xlane.f32.xlu0 %v2964_v37  ;;  %v5913_v37 = vld [vmem:[#allocation95_spill] sm:$0xff]  ;;  %v5233_v10 = vrot.slane %v2263_v43, %v4068_v21  ;;  %v2366_v19 = vrot.slane %v5925_v17, %v4081_v7  ;;  %v1970_v43 = vcombine.low %v1926_v56, %v1958_v33  ;;  %v5935_v17 = vld [vmem:[#allocation104_spill] sm:$0xff] }
 0x2a0   :  { %v5915_v0 = vcombine.low %v5913_v37, %v5914_v23 }
 0x2a1   :  { %2800 = vadd.xlane.f32.xlu1 %v2799_v35  ;;  %v2513_v35 = vcombine.high %v5139_v57, %v5131_v18  ;;  %v2054_v18 = vcombine.low %v5208_v28, %v5205_v42  ;;  %v1790_v57 = vrot.slane %v1782_v63, %v4081_v7  ;;  %v2326_v30 = vcombine.low %v5243_v62, %v5233_v10  ;;  %v5926_v63 = vld [vmem:[#allocation98_spill] sm:$0xff] }
 0x2a2   :  { %v5225_v45 = vrot.slane %v5915_v0, %v4081_v7  ;;  %v5928_v9 = vcombine.low %v5926_v63, %v5927_v50  ;;  %v2826_v36 = vsel %vm1333_vm0, %v1970_v43, 0.0 }
 0x2a3   :  { %2824 = vadd.xlane.f32.xlu0 %v2823_v26  ;;  %v2919_v54 = vsel %vm1333_vm0, %v2513_v35, 0.0  ;;  %v2062_v40 = vrot.slane %v2054_v18, %v4081_v7  ;;  %v2198_v35 = vrot.slane %v2190_v22, %v4081_v7  ;;  %v2638_v18 = vrot.slane %v5931_v4, %v4081_v7 }
 0x2a4   :  { %v1834_v46 = vcombine.low %v1790_v57, %v5225_v45  ;;  %v2230_v49 = vrot.slane %v5928_v9, %v4081_v7  ;;  %v2606_v22 = vrot.slane %v2598_v41, %v4081_v7 }
 0x2a5   :  { %2848 = vadd.xlane.f32.xlu1 %v2847_v29  ;;  %v5922_v29 = vld [vmem:[#allocation9_spill] sm:$0xff]  ;;  %v2106_v51 = vcombine.low %v2062_v40, %v2094_v27 }
 0x2a6   :  { %v2655_v26 = vcombine.high %v5922_v29, %v4652_v60  ;;  %v2802_v11 = vsel %vm1333_vm0, %v1834_v46, 0.0  ;;  %v2334_v60 = vrot.slane %v2326_v30, %v4081_v7  ;;  %v2242_v1 = vcombine.low %v2198_v35, %v2230_v49 }
 0x2a7   :  { %2872 = vadd.xlane.f32.xlu0 %v2871_v53  ;;  %v5293_v53 = vrot.slane %v2671_v47, %v4068_v21  ;;  %v2850_v34 = vsel %vm1333_vm0, %v2106_v51, 0.0 }
 0x2a8   :  { %v5299_v0 = vrot.slane %v2655_v26, %v4068_v21  ;;  %v2378_v61 = vcombine.low %v2334_v60, %v2366_v19  ;;  %v2874_v29 = vsel %vm1333_vm0, %v2242_v1, 0.0  ;;  %v2650_v26 = vcombine.low %v2606_v22, %v2638_v18 }
 0x2a9   :  { %2896 = vadd.xlane.f32.xlu1 %v2895_v6  ;;  %v2462_v6 = vcombine.low %v5211_v16, %v5263_v31  ;;  %v2107_v1 = vcombine.high %v2062_v40, %v2094_v27 }
 0x2aa   :  { %v2734_v8 = vcombine.low %v5299_v0, %v5293_v53  ;;  %v2898_v47 = vsel %vm1333_vm0, %v2378_v61, 0.0  ;;  %v2946_v4 = vsel %vm1333_vm0, %v2650_v26, 0.0  ;;  %v2243_v26 = vcombine.high %v2198_v35, %v2230_v49 }
 0x2ab   :  { %2920 = vadd.xlane.f32.xlu0 %v2919_v54  ;;  %v2470_v30 = vrot.slane %v2462_v6, %v4081_v7  ;;  %v1835_v6 = vcombine.high %v1790_v57, %v5225_v45  ;;  %v1783_v45 = vcombine.high %v5184_v52, %v5173_v5  ;;  %v2651_v57 = vcombine.high %v2606_v22, %v2638_v18 }
 0x2ac   :  { %v2742_v9 = vrot.slane %v2734_v8, %v4081_v7 }
 0x2ad   :  { %2944 = vadd.xlane.f32.xlu1 %v2943_v58  ;;  %v5933_v58 = vld [vmem:[#allocation102_spill] sm:$0xff]  ;;  %v1797_v5 = vrot.slane %v1783_v45, %v4081_v7  ;;  %v2949_v52 = vsel %vm1333_vm0, %v2651_v57, 0.0 }
 0x2ae   :  { %v5934_v54 = vcombine.low %v5932_v12, %v5933_v58 }
 0x2af   :  { %2968 = vadd.xlane.f32.xlu0 %v2967_v59 }
 0x2b0   :  { %v2502_v46 = vrot.slane %v5934_v54, %v4081_v7  ;;  %v1971_v54 = vcombine.high %v1926_v56, %v1958_v33  ;;  %v5938_v33 = vcombine.high %v5913_v37, %v5914_v23  ;;  %v1919_v56 = vcombine.high %v5190_v20, %v5200_v25 }
 0x2b1   :  { %2803 = vadd.xlane.f32.xlu1 %v2802_v11  ;;  %v5936_v11 = vld [vmem:[#allocation105_spill] sm:$0xff]  ;;  %v5939_v37 = vcombine.high %v4864_v3, %v4876_v13  ;;  %v5940_v20 = vcombine.high %v5919_v32, %v5920_v15  ;;  %v5941_v13 = vcombine.high %v5923_v48, %v5924_v55 }
 0x2b2   :  { %v2514_v59 = vcombine.low %v2470_v30, %v2502_v46  ;;  %v5937_v51 = vcombine.low %v5935_v17, %v5936_v11  ;;  %v2829_v8 = vsel %vm1333_vm0, %v1971_v54, 0.0  ;;  %v2515_v27 = vcombine.high %v2470_v30, %v2502_v46 }
 0x2b3   :  { %2827 = vadd.xlane.f32.xlu0 %v2826_v36  ;;  %v1829_v40 = vrot.slane %v5938_v33, %v4081_v7  ;;  %v2101_v23 = vrot.slane %v5939_v37, %v4081_v7  ;;  %v1965_v25 = vrot.slane %v5940_v20, %v4081_v7  ;;  %v1933_v46 = vrot.slane %v1919_v56, %v4081_v7  ;;  %v5947_v20 = vld [vmem:[#allocation19_spill] sm:$0xff] }
 0x2b4   :  { %v2774_v43 = vrot.slane %v5937_v51, %v4081_v7  ;;  %v2922_v41 = vsel %vm1333_vm0, %v2514_v59, 0.0  ;;  %v2877_v51 = vsel %vm1333_vm0, %v2243_v26, 0.0  ;;  %v2373_v32 = vrot.slane %v5941_v13, %v4081_v7 }
 0x2b5   :  { %2851 = vadd.xlane.f32.xlu1 %v2850_v34  ;;  %v2805_v34 = vsel %vm1333_vm0, %v1835_v6, 0.0  ;;  %v1836_v35 = vcombine.low %v1797_v5, %v1829_v40  ;;  %v1972_v30 = vcombine.low %v1933_v46, %v1965_v25  ;;  %v1973_v26 = vcombine.high %v1933_v46, %v1965_v25 }
 0x2b6   :  { %v2786_v61 = vcombine.low %v2742_v9, %v2774_v43  ;;  %v2787_v49 = vcombine.high %v2742_v9, %v2774_v43  ;;  %v5943_v43 = vcombine.high %v5929_v2, %v5930_v14 }
 0x2b7   :  { %2875 = vadd.xlane.f32.xlu0 %v2874_v29  ;;  %v2379_v29 = vcombine.high %v2334_v60, %v2366_v19  ;;  %v2055_v19 = vcombine.high %v5208_v28, %v5205_v42  ;;  %v2925_v60 = vsel %vm1333_vm0, %v2515_v27, 0.0  ;;  %v2191_v42 = vcombine.high %v5197_v38, %v5228_v24 }
 0x2b8   :  { %v2970_v36 = vsel %vm1333_vm0, %v2786_v61, 0.0  ;;  %v2327_v28 = vcombine.high %v5243_v62, %v5233_v10  ;;  %v2973_v3 = vsel %vm1333_vm0, %v2787_v49, 0.0  ;;  %v2808_v15 = vsel %vm1333_vm0, %v1836_v35, 0.0 }
 0x2b9   :  { %2899 = vadd.xlane.f32.xlu1 %v2898_v47  ;;  %v2853_v47 = vsel %vm1333_vm0, %v2107_v1, 0.0  ;;  %v2901_v59 = vsel %vm1333_vm0, %v2379_v29, 0.0  ;;  %v2069_v18 = vrot.slane %v2055_v19, %v4081_v7  ;;  %v5942_v38 = vcombine.high %v5926_v63, %v5927_v50 }
 0x2ba   :  { %v2599_v10 = vcombine.high %v5277_v39, %v5270_v44  ;;  %v2463_v62 = vcombine.high %v5211_v16, %v5263_v31  ;;  %v2341_v48 = vrot.slane %v2327_v28, %v4081_v7  ;;  %v2205_v55 = vrot.slane %v2191_v42, %v4081_v7  ;;  %v5948_v42 = vld [vmem:[#allocation17_spill] sm:$0xff] }
 0x2bb   :  { %2923 = vadd.xlane.f32.xlu0 %v2922_v41  ;;  %v2108_v22 = vcombine.low %v2069_v18, %v2101_v23  ;;  %v2237_v24 = vrot.slane %v5942_v38, %v4081_v7  ;;  %v2645_v9 = vrot.slane %v5943_v43, %v4081_v7  ;;  %v5944_v63 = vcombine.high %v5932_v12, %v5933_v58  ;;  %v5950_v38 = vld [vmem:[#allocation7_spill] sm:$0xff] }
 0x2bc   :  { %v2832_v39 = vsel %vm1333_vm0, %v1972_v30, 0.0  ;;  %v2613_v31 = vrot.slane %v2599_v10, %v4081_v7  ;;  %v2735_v41 = vcombine.high %v5299_v0, %v5293_v53  ;;  %v2477_v2 = vrot.slane %v2463_v62, %v4081_v7 }
 0x2bd   :  { %2947 = vadd.xlane.f32.xlu1 %v2946_v4  ;;  %v2509_v50 = vrot.slane %v5944_v63, %v4081_v7  ;;  %v2856_v44 = vsel %vm1333_vm0, %v2108_v22, 0.0  ;;  %v2380_v4 = vcombine.low %v2341_v48, %v2373_v32  ;;  %v2244_v16 = vcombine.low %v2205_v55, %v2237_v24 }
 0x2be   :  { %v2652_v14 = vcombine.low %v2613_v31, %v2645_v9  ;;  %v5945_v61 = vcombine.high %v5935_v17, %v5936_v11  ;;  %v1837_v0 = vcombine.high %v1797_v5, %v1829_v40  ;;  %v2109_v29 = vcombine.high %v2069_v18, %v2101_v23  ;;  %v5949_v18 = vld [vmem:[#allocation8_spill] sm:$0xff] }
 0x2bf   :  { %2971 = vadd.xlane.f32.xlu0 %v2970_v36  ;;  %v2904_v6 = vsel %vm1333_vm0, %v2380_v4, 0.0  ;;  %v2880_v12 = vsel %vm1333_vm0, %v2244_v16, 0.0  ;;  %v2516_v58 = vcombine.low %v2477_v2, %v2509_v50  ;;  %v2749_v36 = vrot.slane %v2735_v41, %v4081_v7 }
 0x2c0   :  { %v2952_v1 = vsel %vm1333_vm0, %v2652_v14, 0.0  ;;  %v2859_v17 = vsel %vm1333_vm0, %v2109_v29, 0.0  ;;  %v2835_v11 = vsel %vm1333_vm0, %v1973_v26, 0.0  ;;  %v2381_v45 = vcombine.high %v2341_v48, %v2373_v32  ;;  %v5955_v26 = vld [vmem:[#allocation43_spill] sm:$0xff] }
 0x2c1   :  { %2806 = vadd.xlane.f32.xlu1 %v2805_v34  ;;  %v2781_v34 = vrot.slane %v5945_v61, %v4081_v7  ;;  %v2928_v53 = vsel %vm1333_vm0, %v2516_v58, 0.0  ;;  %v2245_v57 = vcombine.high %v2205_v55, %v2237_v24  ;;  %v2653_v27 = vcombine.high %v2613_v31, %v2645_v9  ;;  %v5951_v9 = vld [vmem:[#allocation27_spill] sm:$0xff]  ;;  %v5953_v58 = vld [vmem:[#allocation32_spill] sm:$0xff] }
 0x2c2   :  { %v2517_v33 = vcombine.high %v2477_v2, %v2509_v50 }
 0x2c3   :  { %2830 = vadd.xlane.f32.xlu0 %v2829_v8  ;;  %v2788_v54 = vcombine.low %v2749_v36, %v2781_v34  ;;  %v2955_v40 = vsel %vm1333_vm0, %v2653_v27, 0.0  ;;  %v2789_v19 = vcombine.high %v2749_v36, %v2781_v34  ;;  %v5954_v34 = vld [vmem:[#allocation35_spill] sm:$0xff] }
 0x2c4   :  { %v2931_v56 = vsel %vm1333_vm0, %v2517_v33, 0.0 }
 0x2c5   :  { %2854 = vadd.xlane.f32.xlu1 %v2853_v47  ;;  %v2811_v47 = vsel %vm1333_vm0, %v1837_v0, 0.0  ;;  %v2976_v8 = vsel %vm1333_vm0, %v2788_v54, 0.0  ;;  %v2979_v5 = vsel %vm1333_vm0, %v2789_v19, 0.0 }
 0x2c7   :  { %2878 = vadd.xlane.f32.xlu0 %v2877_v51  ;;  %v2883_v51 = vsel %vm1333_vm0, %v2245_v57, 0.0 }
 0x2c9   :  { %2902 = vadd.xlane.f32.xlu1 %v2901_v59  ;;  %v2907_v59 = vsel %vm1333_vm0, %v2381_v45, 0.0 }
 0x2cb   :  { %2926 = vadd.xlane.f32.xlu0 %v2925_v60 }
 0x2cd   :  { %2950 = vadd.xlane.f32.xlu1 %v2949_v52  ;;  %v5946_v52 = vlaneseq }
 0x2cf   :  { %2974 = vadd.xlane.f32.xlu0 %v2973_v3  ;;  %v3239_v49 = vand.u32 127, %v5946_v52  ;;  %v5957_v52 = vld [vmem:[#allocation51_spill] sm:$0xff] }
 0x2d1   :  { %2809 = vadd.xlane.f32.xlu1 %v2808_v15  ;;  %v5408_v25 = vsub.s32 %v3239_v49, %v5947_v20 }
 0x2d3   :  { %2833 = vadd.xlane.f32.xlu0 %v2832_v39 }
 0x2d5   :  { %2857 = vadd.xlane.f32.xlu1 %v2856_v44  ;;  %v5952_v44 = vld [vmem:[#allocation24_spill] sm:$0xff] }
 0x2d7   :  { %2881 = vadd.xlane.f32.xlu0 %v2880_v12 }
 0x2d9   :  { %2905 = vadd.xlane.f32.xlu1 %v2904_v6 }
 0x2db   :  { %2929 = vadd.xlane.f32.xlu0 %v2928_v53 }
 0x2dd   :  { %2953 = vadd.xlane.f32.xlu1 %v2952_v1 }
 0x2df   :  { %2977 = vadd.xlane.f32.xlu0 %v2976_v8 }
 0x2e1   :  { %2812 = vadd.xlane.f32.xlu1 %v2811_v47 }
 0x2e3   :  { %2836 = vadd.xlane.f32.xlu0 %v2835_v11 }
 0x2e5   :  { %2860 = vadd.xlane.f32.xlu1 %v2859_v17 }
 0x2e7   :  { %2884 = vadd.xlane.f32.xlu0 %v2883_v51 }
 0x2e9   :  { %2908 = vadd.xlane.f32.xlu1 %v2907_v59  ;;  %v5956_v59 = vld [vmem:[#allocation40_spill] sm:$0xff] }
 0x2eb   :  { %2932 = vadd.xlane.f32.xlu0 %v2931_v56 }
 0x2ed   :  { %2956 = vadd.xlane.f32.xlu1 %v2955_v40 }
 0x2ef   :  { %2980 = vadd.xlane.f32.xlu0 %v2979_v5 }
 0x2fb   :  { %v2795_v60 = vpop.xlane.xlu1 %2794 }
 0x2fc   :  { %v2792_v35 = vpop.xlane.xlu0 %2791  ;;  %v2983_v37 = vmul.f32 0.25, %v2795_v60  ;;  %v5958_v60 = vld [vmem:[#allocation48_spill] sm:$0xff] }
 0x2fd   :  { %v2982_v23 = vmul.f32 0.25, %v2792_v35 }
 0x2fe   :  { %v3047_v28 = vadd.f32 %v2983_v37, %v5948_v42 }
 0x2ff   :  { %v3046_v46 = vadd.f32 %v2982_v23, %v5949_v18 }
 0x300   :  { %v2816_v3 = vpop.xlane.xlu0 %2815  ;;  %v3111_v13 = vmul.f32 0.5, %v3047_v28 }
 0x301   :  { %v3110_v32 = vmul.f32 0.5, %v3046_v46  ;;  %v2990_v15 = vmul.f32 0.25, %v2816_v3 }
 0x302   :  { %v3247_v22 = vrot.slane %v3111_v13, %v5408_v25 }
 0x303   :  { %v3243_v30 = vrot.slane %v3110_v32, %v5408_v25  ;;  %v3054_v24 = vadd.f32 %v2990_v15, %v5950_v38  ;;  %v5960_v38 = vld [vmem:[#allocation59_spill] sm:$0xff] }
 0x304   :  { %v2819_v62 = vpop.xlane.xlu0 %2818 }
 0x305   :  { %v5416_v48 = vsel %vm3496_vm1, %v3247_v22, %v3243_v30  ;;  %v2991_v43 = vmul.f32 0.25, %v2819_v62  ;;  %v3118_v50 = vmul.f32 0.5, %v3054_v24  ;;  %v5959_v22 = vld [vmem:[#allocation56_spill] sm:$0xff] }
 0x306   :  { %v2840_v10 = vpop.xlane.xlu1 %2839 }
 0x307   :  { %v2998_v55 = vmul.f32 0.25, %v2840_v10  ;;  %v3055_v39 = vadd.f32 %v2991_v43, %v5952_v44  ;;  %v3275_v6 = vrot.slane %v3118_v50, %v5408_v25  ;;  %v5961_v44 = vld [vmem:[#allocation67_spill] sm:$0xff] }
 0x308   :  { %v2843_v16 = vpop.xlane.xlu0 %2842 }
 0x309   :  { %v3062_v63 = vadd.f32 %v2998_v55, %v5951_v9  ;;  %v3119_v41 = vmul.f32 0.5, %v3055_v39  ;;  %v2999_v2 = vmul.f32 0.25, %v2843_v16 }
 0x30a   :  { %v2864_v4 = vpop.xlane.xlu1 %2863 }
 0x30b   :  { %v3006_v31 = vmul.f32 0.25, %v2864_v4  ;;  %v3126_v14 = vmul.f32 0.5, %v3062_v63  ;;  %v3279_v12 = vrot.slane %v3119_v41, %v5408_v25  ;;  %v3063_v61 = vadd.f32 %v2999_v2, %v5953_v58  ;;  %v5962_v41 = vld [vmem:[#allocation64_spill] sm:$0xff] }
 0x30c   :  { %v2867_v53 = vpop.xlane.xlu0 %2866 }
 0x30d   :  { %v3070_v36 = vadd.f32 %v3006_v31, %v5954_v34  ;;  %v5425_v0 = vsel %vm3496_vm1, %v3279_v12, %v3275_v6  ;;  %v3127_v47 = vmul.f32 0.5, %v3063_v61  ;;  %v3007_v8 = vmul.f32 0.25, %v2867_v53  ;;  %v5964_v53 = vld [vmem:[#allocation72_spill] sm:$0xff] }
 0x30e   :  { %v2888_v1 = vpop.xlane.xlu1 %2887  ;;  %v3307_v29 = vrot.slane %v3126_v14, %v5408_v25 }
 0x30f   :  { %v3014_v54 = vmul.f32 0.25, %v2888_v1  ;;  %v3311_v11 = vrot.slane %v3127_v47, %v5408_v25  ;;  %v3134_v45 = vmul.f32 0.5, %v3070_v36  ;;  %v3071_v51 = vadd.f32 %v3007_v8, %v5956_v59  ;;  %v5963_v36 = vld [vmem:[#allocation10_spill] sm:$0xff] }
 0x310   :  { %v2891_v27 = vpop.xlane.xlu0 %2890 }
 0x311   :  { %v3078_v17 = vadd.f32 %v3014_v54, %v5955_v26  ;;  %v5432_v33 = vsel %vm3496_vm1, %v3311_v11, %v3307_v29  ;;  %v3015_v56 = vmul.f32 0.25, %v2891_v27  ;;  %v3135_v19 = vmul.f32 0.5, %v3071_v51 }
 0x312   :  { %v2912_v57 = vpop.xlane.xlu1 %2911  ;;  %v3339_v37 = vrot.slane %v3134_v45, %v5408_v25 }
 0x313   :  { %v3022_v40 = vmul.f32 0.25, %v2912_v57  ;;  %v3142_v5 = vmul.f32 0.5, %v3078_v17  ;;  %v3079_v35 = vadd.f32 %v3015_v56, %v5958_v60  ;;  %v3343_v23 = vrot.slane %v3135_v19, %v5408_v25 }
 0x314   :  { %v2915_v42 = vpop.xlane.xlu0 %2914 }
 0x315   :  { %v3086_v49 = vadd.f32 %v3022_v40, %v5957_v52  ;;  %v3143_v18 = vmul.f32 0.5, %v3079_v35  ;;  %v3023_v46 = vmul.f32 0.25, %v2915_v42  ;;  %v5439_v3 = vsel %vm3496_vm1, %v3343_v23, %v3339_v37  ;;  %v5965_v40 = vld [vmem:[#allocation29_spill] sm:$0xff] }
 0x316   :  { %v2936_v20 = vpop.xlane.xlu1 %2935  ;;  %v3371_v13 = vrot.slane %v3142_v5, %v5408_v25  ;;  %v5966_v5 = vld [vmem:[#allocation14_spill] sm:$0xff] }
 0x317   :  { %v3030_v28 = vmul.f32 0.25, %v2936_v20  ;;  %v3150_v32 = vmul.f32 0.5, %v3086_v49  ;;  %v3375_v15 = vrot.slane %v3143_v18, %v5408_v25  ;;  %v3087_v30 = vadd.f32 %v3023_v46, %v5959_v22  ;;  %v5967_v46 = vld [vmem:[#allocation45_spill] sm:$0xff] }
 0x318   :  { %v2939_v62 = vpop.xlane.xlu0 %2938  ;;  %v5968_v22 = vld [vmem:[#allocation37_spill] sm:$0xff] }
 0x319   :  { %v3094_v24 = vadd.f32 %v3030_v28, %v5960_v38  ;;  %v3531_v55 = vsel %vm3496_vm1, %v3375_v15, %v3371_v13  ;;  %v3151_v9 = vmul.f32 0.5, %v3087_v30  ;;  %v3031_v63 = vmul.f32 0.25, %v2939_v62 }
 0x31a   :  { %v2960_v10 = vpop.xlane.xlu1 %2959  ;;  %v3403_v50 = vrot.slane %v3150_v32, %v5408_v25 }
 0x31b   :  { %v3038_v43 = vmul.f32 0.25, %v2960_v10  ;;  %v3407_v4 = vrot.slane %v3151_v9, %v5408_v25  ;;  %v3158_v16 = vmul.f32 0.5, %v3094_v24  ;;  %v3095_v2 = vadd.f32 %v3031_v63, %v5962_v41 }
 0x31c   :  { %v2963_v14 = vpop.xlane.xlu0 %2962 }
 0x31d   :  { %v3102_v39 = vadd.f32 %v3038_v43, %v5961_v44  ;;  %v5451_v6 = vsel %vm3496_vm1, %v3407_v4, %v3403_v50  ;;  %v3039_v58 = vmul.f32 0.25, %v2963_v14  ;;  %v3159_v34 = vmul.f32 0.5, %v3095_v2  ;;  %v5969_v50 = vld [vmem:[#allocation61_spill] sm:$0xff] }
 0x31e   :  { %v2798_v31 = vpop.xlane.xlu1 %2797  ;;  %v3435_v47 = vrot.slane %v3158_v16, %v5408_v25 }
 0x31f   :  { %v2984_v12 = vmul.f32 0.25, %v2798_v31  ;;  %v3166_v61 = vmul.f32 0.5, %v3102_v39  ;;  %v3103_v54 = vadd.f32 %v3039_v58, %v5964_v53  ;;  %v3439_v8 = vrot.slane %v3159_v34, %v5408_v25  ;;  %v5970_v39 = vld [vmem:[#allocation53_spill] sm:$0xff] }
 0x320   :  { %v2822_v26 = vpop.xlane.xlu0 %2821  ;;  %v5971_v34 = vld [vmem:[#allocation5_spill] sm:$0xff] }
 0x321   :  { %v3048_v1 = vadd.f32 %v2984_v12, %v5963_v36  ;;  %v3167_v45 = vmul.f32 0.5, %v3103_v54  ;;  %v2992_v57 = vmul.f32 0.25, %v2822_v26  ;;  %v3467_v59 = vrot.slane %v3166_v61, %v5408_v25  ;;  %v5972_v54 = vld [vmem:[#allocation69_spill] sm:$0xff] }
 0x322   :  { %v2846_v29 = vpop.xlane.xlu1 %2845  ;;  %v3545_v51 = vsel %vm3496_vm1, %v3439_v8, %v3435_v47 }
 0x323   :  { %v3112_v17 = vmul.f32 0.5, %v3048_v1  ;;  %v3000_v11 = vmul.f32 0.25, %v2846_v29  ;;  %v3471_v19 = vrot.slane %v3167_v45, %v5408_v25  ;;  %v3056_v52 = vadd.f32 %v2992_v57, %v5966_v5  ;;  %v5973_v57 = vld [vmem:[#allocation34_spill] sm:$0xff] }
 0x324   :  { %v2870_v60 = vpop.xlane.xlu0 %2869 }
 0x325   :  { %v3251_v27 = vrot.slane %v3112_v17, %v5408_v25  ;;  %v3064_v56 = vadd.f32 %v3000_v11, %v5965_v40  ;;  %v3552_v23 = vsel %vm3496_vm1, %v3471_v19, %v3467_v59  ;;  %v3120_v42 = vmul.f32 0.5, %v3056_v52 }
 0x326   :  { %v2894_v49 = vpop.xlane.xlu1 %2893  ;;  %v3008_v28 = vmul.f32 0.25, %v2870_v60 }
 0x327   :  { %v3499_v35 = vsel %vm3498_vm2, %v3251_v27, %v5416_v48  ;;  %v3128_v37 = vmul.f32 0.5, %v3064_v56  ;;  %v3016_v20 = vmul.f32 0.25, %v2894_v49  ;;  %v3283_v32 = vrot.slane %v3120_v42, %v5408_v25  ;;  %v5974_v56 = vld [vmem:[#allocation26_spill] sm:$0xff] }
 0x328   :  { %v3072_v30 = vadd.f32 %v3008_v28, %v5968_v22  ;;  %v2918_v38 = vpop.xlane.xlu0 %2917  ;;  %v5975_v42 = vld [vmem:[#allocation50_spill] sm:$0xff] }
 0x329   :  { %v3315_v18 = vrot.slane %v3128_v37, %v5408_v25  ;;  %v3080_v13 = vadd.f32 %v3016_v20, %v5967_v46  ;;  %v3024_v62 = vmul.f32 0.25, %v2918_v38  ;;  %v3511_v43 = vsel %vm3498_vm2, %v3283_v32, %v5425_v0 }
 0x32a   :  { %v2942_v15 = vpop.xlane.xlu1 %2941  ;;  %v3136_v9 = vmul.f32 0.5, %v3072_v30 }
 0x32b   :  { %v3518_v24 = vsel %vm3498_vm2, %v3315_v18, %v5432_v33  ;;  %v3144_v48 = vmul.f32 0.5, %v3080_v13  ;;  %v3032_v10 = vmul.f32 0.25, %v2942_v15  ;;  %v3088_v4 = vadd.f32 %v3024_v62, %v5970_v39  ;;  %v5976_v18 = vld [vmem:[#allocation42_spill] sm:$0xff] }
 0x32c   :  { %v3347_v16 = vrot.slane %v3136_v9, %v5408_v25  ;;  %v2966_v41 = vpop.xlane.xlu0 %2965  ;;  %v5977_v9 = vld [vmem:[#allocation58_spill] sm:$0xff] }
 0x32d   :  { %v3379_v63 = vrot.slane %v3144_v48, %v5408_v25  ;;  %v3096_v44 = vadd.f32 %v3032_v10, %v5969_v50  ;;  %v3152_v12 = vmul.f32 0.5, %v3088_v4  ;;  %v3040_v0 = vmul.f32 0.25, %v2966_v41 }
 0x32e   :  { %v2801_v31 = vpop.xlane.xlu1 %2800  ;;  %v3525_v58 = vsel %vm3498_vm2, %v3347_v16, %v5439_v3 }
 0x32f   :  { %v3532_v2 = vsel %vm3498_vm2, %v3379_v63, %v3531_v55  ;;  %v3160_v33 = vmul.f32 0.5, %v3096_v44  ;;  %v2985_v14 = vmul.f32 0.25, %v2801_v31  ;;  %v3411_v1 = vrot.slane %v3152_v12, %v5408_v25 }
 0x330   :  { %v3104_v47 = vadd.f32 %v3040_v0, %v5972_v54  ;;  %v2825_v8 = vpop.xlane.xlu0 %2824 }
 0x331   :  { %v3443_v61 = vrot.slane %v3160_v33, %v5408_v25  ;;  %v3049_v36 = vadd.f32 %v2985_v14, %v5971_v34  ;;  %v3539_v26 = vsel %vm3498_vm2, %v3411_v1, %v5451_v6  ;;  %v2993_v11 = vmul.f32 0.25, %v2825_v8 }
 0x332   :  { %v2849_v53 = vpop.xlane.xlu1 %2848  ;;  %v3168_v3 = vmul.f32 0.5, %v3104_v47 }
 0x333   :  { %v5486_v29 = vsel %vm3498_vm2, %v3443_v61, %v3545_v51  ;;  %v3113_v55 = vmul.f32 0.5, %v3049_v36  ;;  %v3001_v17 = vmul.f32 0.25, %v2849_v53  ;;  %v3057_v19 = vadd.f32 %v2993_v11, %v5974_v56  ;;  %v5978_v53 = vld [vmem:[#allocation66_spill] sm:$0xff] }
 0x334   :  { %v3475_v27 = vrot.slane %v3168_v3, %v5408_v25  ;;  %v2873_v5 = vpop.xlane.xlu0 %2872 }
 0x335   :  { %v3255_v45 = vrot.slane %v3113_v55, %v5408_v25  ;;  %v3065_v59 = vadd.f32 %v3001_v17, %v5973_v57  ;;  %v3009_v6 = vmul.f32 0.25, %v2873_v5  ;;  %v3121_v37 = vmul.f32 0.5, %v3057_v19  ;;  %v5979_v55 = vld [vmem:[#allocation21_spill] sm:$0xff] }
 0x336   :  { %v2897_v40 = vpop.xlane.xlu1 %2896  ;;  %v5498_v60 = vsel %vm3498_vm2, %v3475_v27, %v3552_v23 }
 0x337   :  { %v5495_v51 = vsel %vm3500_vm3, %v3255_v45, %v3499_v35  ;;  %v3129_v52 = vmul.f32 0.5, %v3065_v59  ;;  %v3017_v49 = vmul.f32 0.25, %v2897_v40  ;;  %v3073_v46 = vadd.f32 %v3009_v6, %v5976_v18 }
 0x338   :  { %v3287_v13 = vrot.slane %v3121_v37, %v5408_v25  ;;  %v2921_v15 = vpop.xlane.xlu0 %2920 }
 0x339   :  { %v3319_v20 = vrot.slane %v3129_v52, %v5408_v25  ;;  %v3081_v28 = vadd.f32 %v3017_v49, %v5975_v42  ;;  %v3137_v30 = vmul.f32 0.5, %v3073_v46  ;;  %v3025_v23 = vmul.f32 0.25, %v2921_v15  ;;  %v5981_v49 = vld [vmem:[#allocation31_spill] sm:$0xff] }
 0x33a   :  { %v2945_v32 = vpop.xlane.xlu1 %2944  ;;  %v5508_v38 = vsel %vm3500_vm3, %v3287_v13, %v3511_v43  ;;  %v5984_v15 = vld [vmem:[#allocation63_spill] sm:$0xff] }
 0x33b   :  { %v5505_v35 = vsel %vm3500_vm3, %v3319_v20, %v3518_v24  ;;  %v3145_v22 = vmul.f32 0.5, %v3081_v28  ;;  %v3351_v10 = vrot.slane %v3137_v30, %v5408_v25  ;;  %v3089_v63 = vadd.f32 %v3025_v23, %v5977_v9  ;;  %v5982_v20 = vld [vmem:[#allocation23_spill] sm:$0xff] }
 0x33c   :  { %v2969_v50 = vpop.xlane.xlu0 %2968  ;;  %v3033_v34 = vmul.f32 0.25, %v2945_v32  ;;  %v5983_v28 = vld [vmem:[#allocation47_spill] sm:$0xff] }
 0x33d   :  { %v3383_v48 = vrot.slane %v3145_v22, %v5408_v25  ;;  %v5517_v24 = vsel %vm3500_vm3, %v3351_v10, %v3525_v58  ;;  %v3153_v39 = vmul.f32 0.5, %v3089_v63  ;;  %v3041_v58 = vmul.f32 0.25, %v2969_v50  ;;  %v5985_v30 = vld [vmem:[#allocation39_spill] sm:$0xff] }
 0x33e   :  { %v2804_v62 = vpop.xlane.xlu1 %2803  ;;  %v3097_v54 = vadd.f32 %v3033_v34, %v5978_v53  ;;  %v5986_v63 = vld [vmem:[#allocation55_spill] sm:$0xff]  ;;  %v5989_v53 = vld [vmem:[#allocation36_spill] sm:$0xff] }
 0x33f   :  { %v5514_v44 = vsel %vm3500_vm3, %v3383_v48, %v3532_v2  ;;  %v3415_v4 = vrot.slane %v3153_v39, %v5408_v25  ;;  %v2986_v1 = vmul.f32 0.25, %v2804_v62 }
 0x340   :  { %v2828_v16 = vpop.xlane.xlu0 %2827  ;;  %v3161_v59 = vmul.f32 0.5, %v3097_v54 }
 0x341   :  { %v5521_v31 = vsel %vm3500_vm3, %v3415_v4, %v3539_v26  ;;  %v3050_v17 = vadd.f32 %v2986_v1, %v5979_v55  ;;  %v5980_v26 = vld [vmem:[#allocation74_spill] sm:$0xff]  ;;  %v2994_v45 = vmul.f32 0.25, %v2828_v16 }
 0x342   :  { %v2852_v43 = vpop.xlane.xlu1 %2851  ;;  %v3105_v11 = vadd.f32 %v3041_v58, %v5980_v26  ;;  %v3447_v32 = vrot.slane %v3161_v59, %v5408_v25 }
 0x343   :  { %v3002_v3 = vmul.f32 0.25, %v2852_v43  ;;  %v3114_v5 = vmul.f32 0.5, %v3050_v17  ;;  %v3058_v42 = vadd.f32 %v2994_v45, %v5982_v20 }
 0x344   :  { %v2876_v33 = vpop.xlane.xlu0 %2875  ;;  %v3169_v37 = vmul.f32 0.5, %v3105_v11  ;;  %v5991_v11 = vld [vmem:[#allocation28_spill] sm:$0xff] }
 0x345   :  { %v3010_v40 = vmul.f32 0.25, %v2876_v33  ;;  %v3066_v6 = vadd.f32 %v3002_v3, %v5981_v49  ;;  %v3259_v9 = vrot.slane %v3114_v5, %v5408_v25  ;;  %v5990_v3 = vld [vmem:[#allocation52_spill] sm:$0xff] }
 0x346   :  { %v2900_v41 = vpop.xlane.xlu1 %2899  ;;  %v3479_v16 = vrot.slane %v3169_v37, %v5408_v25 }
 0x347   :  { %v3018_v57 = vmul.f32 0.25, %v2900_v41  ;;  %v3074_v23 = vadd.f32 %v3010_v40, %v5985_v30  ;;  %v3130_v43 = vmul.f32 0.5, %v3066_v6  ;;  %v3122_v41 = vmul.f32 0.5, %v3058_v42 }
 0x348   :  { %v2924_v12 = vpop.xlane.xlu0 %2923  ;;  %v3503_v55 = vsel %vm3502_vm4, %v3259_v9, %v5495_v51 }
 0x349   :  { %v3026_v52 = vmul.f32 0.25, %v2924_v12  ;;  %v3082_v18 = vadd.f32 %v3018_v57, %v5983_v28  ;;  %v3138_v58 = vmul.f32 0.5, %v3074_v23  ;;  %v3291_v57 = vrot.slane %v3122_v41, %v5408_v25  ;;  %v5995_v41 = vld [vmem:[#allocation16_spill] sm:$0xff] }
 0x34a   :  { %v2948_v14 = vpop.xlane.xlu1 %2947 }
 0x34b   :  { %v3034_v27 = vmul.f32 0.25, %v2948_v14  ;;  %v3090_v50 = vadd.f32 %v3026_v52, %v5986_v63  ;;  %v3146_v33 = vmul.f32 0.5, %v3082_v18  ;;  %v5987_v14 = vld [vmem:[#allocation20_spill] sm:$0xff]  ;;  %v3355_v6 = vrot.slane %v3138_v58, %v5408_v25 }
 0x34c   :  { %v2972_v61 = vpop.xlane.xlu0 %2971  ;;  %v5992_v52 = vld [vmem:[#allocation44_spill] sm:$0xff] }
 0x34d   :  { %v3042_v13 = vmul.f32 0.25, %v2972_v61  ;;  %v3098_v22 = vadd.f32 %v3034_v27, %v5984_v15  ;;  %v3154_v17 = vmul.f32 0.5, %v3090_v50  ;;  %v3387_v27 = vrot.slane %v3146_v33, %v5408_v25  ;;  %v5993_v15 = vld [vmem:[#allocation68_spill] sm:$0xff] }
 0x34e   :  { %v2807_v0 = vpop.xlane.xlu1 %2806  ;;  %v5994_v50 = vld [vmem:[#allocation60_spill] sm:$0xff] }
 0x34f   :  { %v2987_v46 = vmul.f32 0.25, %v2807_v0  ;;  %v5988_v0 = vld [vmem:[#allocation71_spill] sm:$0xff]  ;;  %v3162_v1 = vmul.f32 0.5, %v3098_v22  ;;  %v3419_v18 = vrot.slane %v3154_v17, %v5408_v25  ;;  %v3534_v23 = vsel %vm3502_vm4, %v3387_v27, %v5514_v44 }
 0x350   :  { %v2831_v36 = vpop.xlane.xlu0 %2830  ;;  %v3106_v61 = vadd.f32 %v3042_v13, %v5988_v0 }
 0x351   :  { %v2995_v4 = vmul.f32 0.25, %v2831_v36  ;;  %v3051_v12 = vadd.f32 %v2987_v46, %v5987_v14  ;;  %v3451_v51 = vrot.slane %v3162_v1, %v5408_v25 }
 0x352   :  { %v2855_v2 = vpop.xlane.xlu1 %2854  ;;  %v3170_v5 = vmul.f32 0.5, %v3106_v61 }
 0x353   :  { %v3003_v48 = vmul.f32 0.25, %v2855_v2  ;;  %v3547_v2 = vsel %vm3500_vm3, %v3447_v32, %v5486_v29  ;;  %v3059_v45 = vadd.f32 %v2995_v4, %v5991_v11  ;;  %v3554_v29 = vsel %vm3500_vm3, %v3479_v16, %v5498_v60 }
 0x354   :  { %v2879_v8 = vpop.xlane.xlu0 %2878  ;;  %v3115_v40 = vmul.f32 0.5, %v3051_v12  ;;  %v3513_v32 = vsel %vm3502_vm4, %v3291_v57, %v5508_v38  ;;  %v3548_v63 = vsel %vm3502_vm4, %v3451_v51, %v3547_v2  ;;  %v5996_v12 = vld [vmem:[#allocation33_spill] sm:$0xff] }
 0x355   :  { %v3011_v34 = vmul.f32 0.25, %v2879_v8  ;;  %v3067_v54 = vadd.f32 %v3003_v48, %v5989_v53  ;;  %v3323_v8 = vrot.slane %v3130_v43, %v5408_v25  ;;  %v3123_v46 = vmul.f32 0.5, %v3059_v45 }
 0x356   :  { %v2903_v47 = vpop.xlane.xlu1 %2902  ;;  %v3483_v48 = vrot.slane %v3170_v5, %v5408_v25  ;;  %v5571_v43 = vsel %vm3502_vm4, %v3419_v18, %v5521_v31 }
 0x357   :  { %v3019_v39 = vmul.f32 0.25, %v2903_v47  ;;  %v3075_v49 = vadd.f32 %v3011_v34, %v5992_v52  ;;  %v3131_v37 = vmul.f32 0.5, %v3067_v54  ;;  %v3295_v16 = vrot.slane %v3123_v46, %v5408_v25  ;;  %v6000_v52 = vld [vmem:[#allocation22_spill] sm:$0xff] }
 0x358   :  { %v2927_v19 = vpop.xlane.xlu0 %2926  ;;  %v5579_v2 = vsel %vm3502_vm4, %v3483_v48, %v3554_v29  ;;  %v5997_v29 = vld [vmem:[#allocation49_spill] sm:$0xff] }
 0x359   :  { %v3083_v26 = vadd.f32 %v3019_v39, %v5990_v3  ;;  %v3027_v20 = vmul.f32 0.25, %v2927_v19  ;;  %v3263_v19 = vrot.slane %v3115_v40, %v5408_v25  ;;  %v3139_v9 = vmul.f32 0.5, %v3075_v49  ;;  %v5999_v40 = vld [vmem:[#allocation41_spill] sm:$0xff] }
 0x35a   :  { %v2951_v56 = vpop.xlane.xlu1 %2950 }
 0x35b   :  { %v3035_v59 = vmul.f32 0.25, %v2951_v56  ;;  %v3147_v60 = vmul.f32 0.5, %v3083_v26  ;;  %v3520_v56 = vsel %vm3502_vm4, %v3323_v8, %v5505_v35  ;;  %v3327_v35 = vrot.slane %v3131_v37, %v5408_v25  ;;  %v6001_v37 = vld [vmem:[#allocation76_spill] sm:$0xff] }
 0x35c   :  { %v5532_v62 = vpop.xlane.xlu0 %2974  ;;  %v3091_v38 = vadd.f32 %v3027_v20, %v5994_v50  ;;  %v3505_v34 = vsel %vm3504_vm5, %v3263_v19, %v3503_v55  ;;  %v3359_v31 = vrot.slane %v3139_v9, %v5408_v25  ;;  %v6003_v9 = vld [vmem:[#allocation57_spill] sm:$0xff] }
 0x35d   :  { %v3099_v22 = vadd.f32 %v3035_v59, %v5993_v15  ;;  %v3391_v44 = vrot.slane %v3147_v60, %v5408_v25  ;;  %v3521_v58 = vsel %vm3504_vm5, %v3327_v35, %v3520_v56  ;;  %v3043_v54 = vmul.f32 0.25, %v5532_v62  ;;  %v5998_v59 = vld [vmem:[#allocation25_spill] sm:$0xff]  ;;  %v6004_v35 = vld [vmem:[#allocation38_spill] sm:$0xff] }
 0x35e   :  { %v2810_v10 = vpop.xlane.xlu1 %2809  ;;  %v5583_v53 = vmul.f32 0.5, %v3091_v38  ;;  %v6005_v38 = vld [vmem:[#allocation30_spill] sm:$0xff] }
 0x35f   :  { %v2988_v13 = vmul.f32 0.25, %v2810_v10  ;;  %v3527_v10 = vsel %vm3502_vm4, %v3355_v6, %v5517_v24  ;;  %v3163_v14 = vmul.f32 0.5, %v3099_v22  ;;  %v5587_v26 = vsel %vm3504_vm5, %v3391_v44, %v3534_v23 }
 0x360   :  { %v2834_v47 = vpop.xlane.xlu0 %2833  ;;  %v3528_v62 = vsel %vm3504_vm5, %v3359_v31, %v3527_v10  ;;  %v3423_v6 = vrot.slane %v5583_v53, %v5408_v25  ;;  %v3107_v20 = vadd.f32 %v3043_v54, %v6001_v37 }
 0x361   :  { %v3052_v33 = vadd.f32 %v2988_v13, %v5995_v41  ;;  %v2996_v61 = vmul.f32 0.25, %v2834_v47  ;;  %v5590_v47 = vsel %vm3504_vm5, %v3295_v16, %v3513_v32  ;;  %v3455_v45 = vrot.slane %v3163_v14, %v5408_v25  ;;  %v6006_v41 = vld [vmem:[#allocation73_spill] sm:$0xff] }
 0x362   :  { %v2858_v36 = vpop.xlane.xlu1 %2857 }
 0x363   :  { %v3004_v30 = vmul.f32 0.25, %v2858_v36  ;;  %v3116_v55 = vmul.f32 0.5, %v3052_v33  ;;  %v3060_v27 = vadd.f32 %v2996_v61, %v5998_v59  ;;  %v3549_v22 = vsel %vm3504_vm5, %v3455_v45, %v3548_v63  ;;  %v6008_v59 = vld [vmem:[#allocation46_spill] sm:$0xff] }
 0x364   :  { %v2882_v28 = vpop.xlane.xlu0 %2881 }
 0x365   :  { %v3068_v24 = vadd.f32 %v3004_v30, %v5996_v12  ;;  %v3012_v1 = vmul.f32 0.25, %v2882_v28  ;;  %v3267_v13 = vrot.slane %v3116_v55, %v5408_v25  ;;  %v3124_v19 = vmul.f32 0.5, %v3060_v27 }
 0x366   :  { %v2906_v42 = vpop.xlane.xlu1 %2905 }
 0x367   :  { %v3020_v0 = vmul.f32 0.25, %v2906_v42  ;;  %v3132_v8 = vmul.f32 0.5, %v3068_v24  ;;  %v3076_v5 = vadd.f32 %v3012_v1, %v5999_v40  ;;  %v6002_v42 = vld [vmem:[#allocation65_spill] sm:$0xff]  ;;  %v3507_v12 = vsel %vm3506_vm6, %v3267_v13, %v3505_v34 }
 0x368   :  { %v2930_v4 = vpop.xlane.xlu0 %2929  ;;  %v3299_v54 = vrot.slane %v3124_v19, %v5408_v25 }
 0x369   :  { %v3084_v57 = vadd.f32 %v3020_v0, %v5997_v29  ;;  %v3028_v51 = vmul.f32 0.25, %v2930_v4  ;;  %v3331_v30 = vrot.slane %v3132_v8, %v5408_v25  ;;  %v3140_v48 = vmul.f32 0.5, %v3076_v5 }
 0x36a   :  { %v2954_v39 = vpop.xlane.xlu1 %2953  ;;  %v5608_v4 = vmul.f32 0.5, %v3107_v20 }
 0x36b   :  { %v3036_v36 = vmul.f32 0.25, %v2954_v39  ;;  %v3148_v23 = vmul.f32 0.5, %v3084_v57  ;;  %v3092_v10 = vadd.f32 %v3028_v51, %v6003_v9  ;;  %v3522_v31 = vsel %vm3506_vm6, %v3331_v30, %v3521_v58  ;;  %v6010_v30 = vld [vmem:[#allocation62_spill] sm:$0xff] }
 0x36c   :  { %v2978_v3 = vpop.xlane.xlu0 %2977 }
 0x36d   :  { %v3100_v28 = vadd.f32 %v3036_v36, %v6002_v42  ;;  %v3044_v60 = vmul.f32 0.25, %v2978_v3  ;;  %v3395_v1 = vrot.slane %v3148_v23, %v5408_v25  ;;  %v3156_v3 = vmul.f32 0.5, %v3092_v10 }
 0x36e   :  { %v2813_v17 = vpop.xlane.xlu1 %2812 }
 0x36f   :  { %v2989_v11 = vmul.f32 0.25, %v2813_v17  ;;  %v3164_v44 = vmul.f32 0.5, %v3100_v28  ;;  %v3108_v33 = vadd.f32 %v3044_v60, %v6006_v41  ;;  %v3363_v17 = vrot.slane %v3140_v48, %v5408_v25 }
 0x370   :  { %v2837_v46 = vpop.xlane.xlu0 %2836  ;;  %v3487_v28 = vrot.slane %v5608_v4, %v5408_v25  ;;  %v3515_v60 = vsel %vm3506_vm6, %v3299_v54, %v5590_v47  ;;  %v3427_v9 = vrot.slane %v3156_v3, %v5408_v25 }
 0x371   :  { %v3053_v49 = vadd.f32 %v2989_v11, %v6000_v52  ;;  %v2997_v15 = vmul.f32 0.25, %v2837_v46  ;;  %v6007_v11 = vld [vmem:[#allocation54_spill] sm:$0xff]  ;;  %v3459_v8 = vrot.slane %v3164_v44, %v5408_v25  ;;  %v3172_v29 = vmul.f32 0.5, %v3108_v33 }
 0x372   :  { %v2861_v18 = vpop.xlane.xlu1 %2860  ;;  %v6009_v46 = vld [vmem:[#allocation70_spill] sm:$0xff] }
 0x373   :  { %v3117_v56 = vmul.f32 0.5, %v3053_v49  ;;  %v3005_v32 = vmul.f32 0.25, %v2861_v18  ;;  %v3061_v39 = vadd.f32 %v2997_v15, %v6005_v38  ;;  %v3536_v18 = vsel %vm3506_vm6, %v3395_v1, %v5587_v26  ;;  %v6011_v44 = vld [vmem:[#allocation78_spill] sm:$0xff] }
 0x374   :  { %v2885_v63 = vpop.xlane.xlu0 %2884  ;;  %v3550_v48 = vsel %vm3506_vm6, %v3459_v8, %v3549_v22 }
 0x375   :  { %v3069_v50 = vadd.f32 %v3005_v32, %v6004_v35  ;;  %v3271_v16 = vrot.slane %v3117_v56, %v5408_v25  ;;  %v3125_v61 = vmul.f32 0.5, %v3061_v39  ;;  %v3013_v36 = vmul.f32 0.25, %v2885_v63 }
 0x376   :  { %v2909_v14 = vpop.xlane.xlu1 %2908  ;;  %v3529_v56 = vsel %vm3506_vm6, %v3363_v17, %v3528_v62  ;;  %v3491_v35 = vrot.slane %v3172_v29, %v5408_v25 }
 0x377   :  { %v3133_v24 = vmul.f32 0.5, %v3069_v50  ;;  %v3021_v0 = vmul.f32 0.25, %v2909_v14  ;;  %v3509_v34 = vsel %vm3508_vm7, %v3271_v16, %v3507_v12  ;;  %v3077_v58 = vadd.f32 %v3013_v36, %v6008_v59 }
 0x378   :  { %v2933_v27 = vpop.xlane.xlu0 %2932  ;;  %v3303_v52 = vrot.slane %v3125_v61, %v5408_v25  ;;  %v3542_v61 = vsel %vm3504_vm5, %v3423_v6, %v5571_v43 }
 0x379   :  { %v3335_v55 = vrot.slane %v3133_v24, %v5408_v25  ;;  %v3085_v45 = vadd.f32 %v3021_v0, %v6007_v11  ;;  %v3141_v20 = vmul.f32 0.5, %v3077_v58  ;;  %v3029_v42 = vmul.f32 0.25, %v2933_v27 }
 0x37a   :  { %v2957_v57 = vpop.xlane.xlu1 %2956  ;;  %v3516_v47 = vsel %vm3508_vm7, %v3303_v52, %v3515_v60  ;;  %v3543_v11 = vsel %vm3506_vm6, %v3427_v9, %v3542_v61 }
 0x37b   :  { %v3523_v40 = vsel %vm3508_vm7, %v3335_v55, %v3522_v31  ;;  %v3149_v5 = vmul.f32 0.5, %v3085_v45  ;;  %v3037_v49 = vmul.f32 0.25, %v2957_v57  ;;  %v3367_v15 = vrot.slane %v3141_v20, %v5408_v25 }
 0x37c   :  { %v3567_v51 = vcombine.low %v3509_v34, %v3523_v40  ;;  %v3568_v37 = vcombine.high %v3509_v34, %v3523_v40  ;;  %v3093_v23 = vadd.f32 %v3029_v42, %v6010_v30  ;;  %v2981_v19 = vpop.xlane.xlu0 %2980  ;;  %v3556_v31 = vsel %vm3504_vm5, %v3487_v28, %v5579_v2 }
 0x37d   :  { %v3101_v13 = vadd.f32 %v3037_v49, %v6009_v46  ;;  %v3399_v32 = vrot.slane %v3149_v5, %v5408_v25  ;;  %v3045_v26 = vmul.f32 0.25, %v2981_v19  ;;  %v3530_v50 = vsel %vm3508_vm7, %v3367_v15, %v3529_v56 }
 0x37e   :  { %v3157_v62 = vmul.f32 0.5, %v3093_v23  ;;  %v3583_v39 = vcombine.low %v3516_v47, %v3530_v50  ;;  %v3584_v4 = vcombine.high %v3516_v47, %v3530_v50  ;;  %v3575_v41 = vrot.slane %v3567_v51, %v4068_v21 }
 0x37f   :  { %v3165_v10 = vmul.f32 0.5, %v3101_v13  ;;  %v3109_v16 = vadd.f32 %v3045_v26, %v6011_v44  ;;  %v3582_v22 = vrot.slane %v3568_v37, %v4068_v21  ;;  %v3537_v33 = vsel %vm3508_vm7, %v3399_v32, %v3536_v18 }
 0x380   :  { %v3431_v14 = vrot.slane %v3157_v62, %v5408_v25  ;;  %v3591_v12 = vrot.slane %v3583_v39, %v4068_v21  ;;  %v3598_v24 = vrot.slane %v3584_v4, %v4068_v21  ;;  %v3557_v45 = vsel %vm3506_vm6, %v3491_v35, %v3556_v31 }
 0x381   :  { %v3463_v38 = vrot.slane %v3165_v10, %v5408_v25  ;;  %v3173_v0 = vmul.f32 0.5, %v3109_v16 }
 0x382   :  { %v3632_v17 = vcombine.high %v3575_v41, %v3591_v12  ;;  %v3631_v3 = vcombine.low %v3575_v41, %v3591_v12  ;;  %v3647_v55 = vcombine.low %v3582_v22, %v3598_v24  ;;  %v3648_v8 = vcombine.high %v3582_v22, %v3598_v24 }
 0x383   :  { %v3551_v63 = vsel %vm3508_vm7, %v3463_v38, %v3550_v48  ;;  %v3495_v36 = vrot.slane %v3173_v0, %v5408_v25  ;;  %v3544_v34 = vsel %vm3508_vm7, %v3431_v14, %v3543_v11 }
 0x384   :  { %v3599_v1 = vcombine.low %v3537_v33, %v3551_v63  ;;  %v3600_v54 = vcombine.high %v3537_v33, %v3551_v63  ;;  %v3646_v5 = vrot.slane %v3632_v17, %v4081_v7  ;;  %v3639_v52 = vrot.slane %v3631_v3, %v4081_v7 }
 0x385   :  { %v3558_v53 = vsel %vm3508_vm7, %v3495_v36, %v3557_v45  ;;  %v3655_v49 = vrot.slane %v3647_v55, %v4081_v7 }
 0x386   :  { %v3615_v43 = vcombine.low %v3544_v34, %v3558_v53  ;;  %v3616_v6 = vcombine.high %v3544_v34, %v3558_v53  ;;  %v3607_v2 = vrot.slane %v3599_v1, %v4068_v21  ;;  %v3614_v29 = vrot.slane %v3600_v54, %v4068_v21 }
 0x388   :  { %v3623_v25 = vrot.slane %v3615_v43, %v4068_v21  ;;  %v3630_v57 = vrot.slane %v3616_v6, %v4068_v21  ;;  %v3662_v21 = vrot.slane %v3648_v8, %v4081_v7 }
 0x38a   :  { %v3664_v59 = vcombine.high %v3607_v2, %v3623_v25  ;;  %v3663_v58 = vcombine.low %v3607_v2, %v3623_v25  ;;  %v3679_v27 = vcombine.low %v3614_v29, %v3630_v57  ;;  %v3680_v40 = vcombine.high %v3614_v29, %v3630_v57 }
 0x38c   :  { %v3678_v51 = vrot.slane %v3664_v59, %v4081_v7  ;;  %v3671_v37 = vrot.slane %v3663_v58, %v4081_v7  ;;  %v3687_v20 = vrot.slane %v3679_v27, %v4081_v7  ;;  %v3694_v42 = vrot.slane %v3680_v40, %v4081_v7 }
 0x38e   :  { %v3697_v28 = vcombine.low %v3646_v5, %v3678_v51  ;;  %v3696_v18 = vcombine.high %v3639_v52, %v3671_v37  ;;  %v3700_v60 = vcombine.high %v3655_v49, %v3687_v20  ;;  %v3698_v46 = vcombine.high %v3646_v5, %v3678_v51 }
 0x38f   :  { %v3702_v13 = vcombine.high %v3662_v21, %v3694_v42  ;;  %v3699_v56 = vcombine.low %v3655_v49, %v3687_v20  ;;  %v3701_v32 = vcombine.low %v3662_v21, %v3694_v42  ;;  %v3695_v15 = vcombine.low %v3639_v52, %v3671_v37 }
 0x390   :  { %3708 = vrot.lane.b32.xlu0 %v3697_v28, %s3822_s26  ;;  %3704 = vrot.lane.b32.xlu1 %v3696_v18, %s3812_s17 }
 0x394   :  { %3720 = vrot.lane.b32.xlu0 %v3700_v60, %s3823_s27  ;;  %3712 = vrot.lane.b32.xlu1 %v3698_v46, %s3824_s28 }
 0x398   :  { %3728 = vrot.lane.b32.xlu0 %v3702_v13, %s3825_s29  ;;  %3716 = vrot.lane.b32.xlu1 %v3699_v56, %s3826_s30 }
 0x39c   :  { %3724 = vrot.lane.b32.xlu1 %v3701_v32, %s3827_s2 }
 0x402   :  { %v3705_v7 = vpop.permute.xlu1 %3704  ;;  %v3709_v30 = vpop.permute.xlu0 %3708 }
 0x403   :  { %v3732_v23 = vsel %vm3731_vm8, %v3695_v15, %v3705_v7 }
 0x404   :  { %v3734_v9 = vsel %vm3733_vm9, %v3732_v23, %v3709_v30 }
 0x406   :  { %v3713_v19 = vpop.permute.xlu1 %3712  ;;  %v3721_v48 = vpop.permute.xlu0 %3720 }
 0x407   :  { %v3736_v10 = vsel %vm3735_vm10, %v3734_v9, %v3713_v19 }
 0x40a   :  { %v3717_v26 = vpop.permute.xlu1 %3716  ;;  %v3729_v62 = vpop.permute.xlu0 %3728 }
 0x40b   :  { %v3738_v35 = vsel %vm3737_vm11, %v3736_v10, %v3717_v26 }
 0x40c   :  { %v3740_v50 = vsel %vm3739_vm12, %v3738_v35, %v3721_v48 }
 0x40e   :  { %v3725_v47 = vpop.permute.xlu1 %3724 }
 0x40f   :  { %v3742_v38 = vsel %vm3741_vm13, %v3740_v50, %v3725_v47 }
 0x410   :  { %v3744_v39 = vsel %vm3743_vm14, %v3742_v38, %v3729_v62 }
 0x411   :  { %3746 = vst.msk [vmem:[%s5678_s1] sm:$0xff] %vm3745_vm15, %v3744_v39 }
 0x412   :  { %3751 = vsyncpa [#allocation3], 1 }

</bundles_post_ra>
